<compile_context>
chip_gen: v7x
topology: tpu7x:2x2x1
jax: 0.10.0
libtpu: 0.0.40
codegen_flags: <defaults>
</compile_context>

<pallas_src>
import functools

import numpy as np

import jax
import jax.numpy as jnp
from jax import lax
from jax.experimental import pallas as pl
from jax.experimental.pallas import tpu as pltpu

BN_EPS = 1e-5


def _round_up(v, a):
    return (v + a - 1) // a * a


# ---------------------------------------------------------------------------
# Fused Inception_A kernel (one grid step = NB batch images, lane-flattened)
# ---------------------------------------------------------------------------
def _inception_a_kernel(x_ref, mask_ref,
                        w1_ref, b1_ref,        # fused 1x1 convs (+shortcut proj), BN folded
                        w2_ref, b2_ref,        # branch2 3x3
                        w3_ref, b3_ref,        # branch3 3x3 (first)
                        w4_ref, b4_ref,        # branch3 3x3 (second)
                        wl_ref, bl_ref,        # conv_linear (1x1, bias)
                        o_ref, *, W, dims, has_proj, compute_dtype):
    B1, P3, NL = dims["B1_PAD"], dims["PAD3"], dims["NLIN_PAD"]

    x = x_ref[...]                              # (CIN_PAD, L) f32, channel-major
    L = x.shape[1]
    mask = mask_ref[...]                        # (9*P3, L) compute dtype (0/1)

    # --- all 1x1 convs on x fused into ONE matmul (b1 | b2_1x1 | b3_1x1 | proj)
    y = jnp.dot(w1_ref[...], x.astype(compute_dtype),
                preferred_element_type=jnp.float32)
    y = y + b1_ref[...]                         # BN scale folded into weights
    yc = jnp.clip(y, 0.0, 6.0)                  # ReLU6 on branch heads
    out1 = yc[:B1]                              # branch1 output
    t2 = yc[B1:B1 + P3]                         # branch2 1x1 output (padded rows = 0)
    t3 = yc[B1 + P3:B1 + 2 * P3]                # branch3 1x1 output (padded rows = 0)
    if has_proj:
        sc = y[B1 + 2 * P3:B1 + 2 * P3 + NL]    # shortcut proj: conv+BN, NO ReLU
    else:
        sc = x                                  # identity shortcut (Cin == n1_linear)

    def conv3x3(t, w_ref, b_ref):
        # 3x3 / stride 1 / pad 1 as one im2col matmul.  Static lane rotations go
        # through the XLU; wrap-around / cross-image bleed lands only on lanes
        # zeroed by the tap mask, so one dense mask multiply restores zero-padding.
        taps = []
        for dy in range(3):
            for dx in range(3):
                d = (dy - 1) * W + (dx - 1)     # out[:, m] = t[:, m + d]
                taps.append(pltpu.roll(t, shift=(-d) % L, axis=1) if d else t)
        patch = jnp.concatenate(taps, axis=0).astype(compute_dtype) * mask
        z = jnp.dot(w_ref[...], patch, preferred_element_type=jnp.float32)
        return jnp.clip(z + b_ref[...], 0.0, 6.0)           # folded BN + ReLU6

    out2 = conv3x3(t2, w2_ref, b2_ref)
    u = conv3x3(t3, w3_ref, b3_ref)
    out3 = conv3x3(u, w4_ref, b4_ref)

    # --- concat (all groups 8-aligned) + conv_linear + residual + ReLU -------
    cat = jnp.concatenate([out1, out2, out3], axis=0)        # f32 (CCAT_PAD, L)
    out = jnp.dot(wl_ref[...], cat.astype(compute_dtype),
                  preferred_element_type=jnp.float32)
    out = out + bl_ref[...] + sc
    o_ref[...] = jnp.maximum(out, 0.0).astype(o_ref.dtype)


# ---------------------------------------------------------------------------
# Host-side helpers
# ---------------------------------------------------------------------------
def _expanded_tap_mask(H, W, M_pad, pad3, nb, dtype):
    """(9*pad3, nb*M_pad) 0/1 mask: zero-padding boundaries + lane-pad region."""
    m = np.ones((9, H, W), np.float32)
    for dy in range(3):
        for dx in range(3):
            oy, ox = dy - 1, dx - 1
            t = dy * 3 + dx
            if oy < 0:
                m[t, :-oy, :] = 0.0
            if oy > 0:
                m[t, H - oy:, :] = 0.0
            if ox < 0:
                m[t, :, :-ox] = 0.0
            if ox > 0:
                m[t, :, W - ox:] = 0.0
    m9 = np.zeros((9, M_pad), np.float32)
    m9[:, :H * W] = m.reshape(9, H * W)
    full = np.broadcast_to(m9[:, None, :], (9, pad3, M_pad)).reshape(9 * pad3, M_pad)
    full = np.tile(full, (1, nb))
    return jnp.asarray(full, dtype)


def _pick_nb(N, M_pad, pad3, budget_bytes=8 << 20, max_lanes=32768):
    """Largest divisor of N whose per-step working set stays under a VMEM budget."""
    per_image = (3 * 9 * pad3 + 128) * M_pad * 4   # rough f32 working-set estimate
    nb = 1
    for cand in range(1, N + 1):
        if N % cand:
            continue
        if cand * per_image <= budget_bytes and cand * M_pad <= max_lanes:
            nb = cand
    return nb


def inception_a_forward(x_nchw, kp):
    """x_nchw: (N, Cin, H, W) float32 (PyTorch layout). Returns (N, n1_linear, H, W)."""
    N, Cin, H, W = x_nchw.shape
    dims = kp["dims"]
    CIN_PAD, NLIN_PAD, P3 = dims["CIN_PAD"], dims["NLIN_PAD"], dims["PAD3"]
    nlin = kp["nlin"]
    cdt = kp["compute_dtype"]
    if not kp["has_proj"]:
        assert Cin == nlin, "identity shortcut requires in_channels == n1_linear"

    M = H * W
    M_pad = _round_up(M, 128)                     # lane-dense loads/stores
    NB = _pick_nb(N, M_pad, P3)
    L = NB * M_pad

    # NCHW -> channel-major (CIN_PAD, N*M_pad); lane index = b*M_pad + y*W + x.
    x_cm = jnp.transpose(x_nchw.reshape(N, Cin, M), (1, 0, 2))
    x_cm = jnp.pad(x_cm, ((0, CIN_PAD - Cin), (0, 0), (0, M_pad - M)))
    x_cm = x_cm.reshape(CIN_PAD, N * M_pad).astype(jnp.float32)

    mask_full = _expanded_tap_mask(H, W, M_pad, P3, NB, cdt)

    params = [kp["w1"], kp["b1"], kp["w2"], kp["b2"], kp["w3"], kp["b3"],
              kp["w4"], kp["b4"], kp["wl"], kp["bl"]]
    param_specs = [pl.BlockSpec(p.shape, lambda i: (0, 0)) for p in params]

    kern = functools.partial(_inception_a_kernel, W=W, dims=dims,
                             has_proj=kp["has_proj"], compute_dtype=cdt)

    out = pl.pallas_call(
        kern,
        out_shape=jax.ShapeDtypeStruct((NLIN_PAD, N * M_pad), jnp.float32),
        grid=(N // NB,),
        in_specs=[pl.BlockSpec((CIN_PAD, L), lambda i: (0, i)),
                  pl.BlockSpec(mask_full.shape, lambda i: (0, 0))] + param_specs,
        out_specs=pl.BlockSpec((NLIN_PAD, L), lambda i: (0, i)),
        compiler_params=pltpu.CompilerParams(
            dimension_semantics=("parallel",),
            vmem_limit_bytes=64 * 1024 * 1024),
    )(x_cm, mask_full, *params)

    out = out.reshape(NLIN_PAD, N, M_pad)[:nlin, :, :M]
    return jnp.transpose(out, (1, 0, 2)).reshape(N, nlin, H, W)


# ---------------------------------------------------------------------------
# Parameter init (deterministic, synthetic), BN folding, padded kernel layouts
# ---------------------------------------------------------------------------
def fold_bn(gamma, beta, mean, var):
    scale = gamma / jnp.sqrt(var + BN_EPS)
    bias = beta - mean * scale
    return scale, bias


def make_convbn(key, kh, kw, cin, cout):
    k1, k2, k3, k4, k5 = jax.random.split(key, 5)
    w = jax.random.normal(k1, (kh, kw, cin, cout), jnp.float32) * 0.1  # HWIO
    gamma = jax.random.uniform(k2, (cout,), jnp.float32, 0.5, 1.5)
    beta = jax.random.normal(k3, (cout,), jnp.float32) * 0.1
    mean = jax.random.normal(k4, (cout,), jnp.float32) * 0.1
    var = jax.random.uniform(k5, (cout,), jnp.float32, 0.5, 1.5)
    scale, bias = fold_bn(gamma, beta, mean, var)
    return {"w": w, "s": scale, "b": bias}


def init_params(key, in_channels, b1, b2_1x1, b2_3x3, b3_1x1, b3_3x3_1, b3_3x3_2,
                n1_linear):
    keys = jax.random.split(key, 10)
    p = {
        "b1": make_convbn(keys[0], 1, 1, in_channels, b1),
        "b2a": make_convbn(keys[1], 1, 1, in_channels, b2_1x1),
        "b2b": make_convbn(keys[2], 3, 3, b2_1x1, b2_3x3),
        "b3a": make_convbn(keys[3], 1, 1, in_channels, b3_1x1),
        "b3b": make_convbn(keys[4], 3, 3, b3_1x1, b3_3x3_1),
        "b3c": make_convbn(keys[5], 3, 3, b3_3x3_1, b3_3x3_2),
    }
    ccat = b1 + b2_3x3 + b3_3x3_2
    p["lin_w"] = jax.random.normal(keys[6], (1, 1, ccat, n1_linear), jnp.float32) * 0.1
    p["lin_b"] = jax.random.normal(keys[7], (n1_linear,), jnp.float32) * 0.1
    p["has_shortcut_proj"] = in_channels != n1_linear
    if p["has_shortcut_proj"]:
        p["sc"] = make_convbn(keys[8], 1, 1, in_channels, n1_linear)  # conv(no bias)+BN
    return p


def prepare_kernel_params(p, compute_dtype=jnp.bfloat16):
    """Pad/fuse parameters into the sublane-aligned, BN-folded kernel layouts."""
    cin = p["b1"]["w"].shape[2]
    b1_c = p["b1"]["w"].shape[3]
    b2a_c, b2b_c = p["b2a"]["w"].shape[3], p["b2b"]["w"].shape[3]
    b3a_c, b3b_c, b3c_c = (p["b3a"]["w"].shape[3], p["b3b"]["w"].shape[3],
                           p["b3c"]["w"].shape[3])
    nlin = p["lin_w"].shape[3]
    has_proj = bool(p["has_shortcut_proj"])

    SUB = 8
    align_in = 16 if compute_dtype == jnp.bfloat16 else 8   # 3x3-conv input channels
    CIN_PAD = _round_up(cin, SUB)
    B1_PAD = _round_up(b1_c, SUB)
    PAD3 = _round_up(max(b2a_c, b3a_c, b3b_c), align_in)
    B2_OUT_PAD = _round_up(b2b_c, SUB)
    B3_OUT_PAD = _round_up(b3c_c, SUB)
    NLIN_PAD = _round_up(nlin, SUB)

    def pad_to(a, shape):
        return jnp.pad(a, [(0, s - d) for s, d in zip(shape, a.shape)])

    # --- fused 1x1 row blocks: [branch1 | branch2-1x1 | branch3-1x1 | proj] ---
    def blk_1x1(cb, rows):
        w = (cb["w"][0, 0] * cb["s"][None, :]).T            # fold BN scale; (cout, cin)
        return pad_to(w, (rows, CIN_PAD)), pad_to(cb["b"], (rows,))

    blocks = [blk_1x1(p["b1"], B1_PAD), blk_1x1(p["b2a"], PAD3), blk_1x1(p["b3a"], PAD3)]
    if has_proj:
        blocks.append(blk_1x1(p["sc"], NLIN_PAD))
    w1 = jnp.concatenate([b[0] for b in blocks], axis=0)
    b1v = jnp.concatenate([b[1] for b in blocks])[:, None]

    # --- 3x3 convs -> (cout_pad, 9*cin_pad), col = (dy*3+dx)*cin_pad + ci ------
    def flat3x3(cb, cin_pad, cout_pad):
        w = cb["w"] * cb["s"][None, None, None, :]          # fold BN scale
        w = pad_to(w, (3, 3, cin_pad, cout_pad))
        wf = w.reshape(9 * cin_pad, cout_pad).T
        return wf.astype(compute_dtype), pad_to(cb["b"], (cout_pad,))[:, None]

    w2, b2v = flat3x3(p["b2b"], PAD3, B2_OUT_PAD)
    w3, b3v = flat3x3(p["b3b"], PAD3, PAD3)
    w4, b4v = flat3x3(p["b3c"], PAD3, B3_OUT_PAD)

    # --- conv_linear: columns placed to match the padded concat layout --------
    wl_o = p["lin_w"][0, 0].T                               # (nlin, ccat)
    wl = jnp.zeros((NLIN_PAD, B1_PAD + B2_OUT_PAD + B3_OUT_PAD), jnp.float32)
    wl = wl.at[:nlin, 0:b1_c].set(wl_o[:, :b1_c])
    wl = wl.at[:nlin, B1_PAD:B1_PAD + b2b_c].set(wl_o[:, b1_c:b1_c + b2b_c])
    wl = wl.at[:nlin, B1_PAD + B2_OUT_PAD:B1_PAD + B2_OUT_PAD + b3c_c].set(
        wl_o[:, b1_c + b2b_c:])
    bl = pad_to(p["lin_b"], (NLIN_PAD,))[:, None]

    return {
        "w1": w1.astype(compute_dtype), "b1": b1v,
        "w2": w2, "b2": b2v, "w3": w3, "b3": b3v, "w4": w4, "b4": b4v,
        "wl": wl.astype(compute_dtype), "bl": bl,
        "dims": {"CIN_PAD": CIN_PAD, "B1_PAD": B1_PAD, "PAD3": PAD3,
                 "B2_OUT_PAD": B2_OUT_PAD, "B3_OUT_PAD": B3_OUT_PAD,
                 "NLIN_PAD": NLIN_PAD},
        "nlin": nlin, "has_proj": has_proj, "compute_dtype": compute_dtype,
    }


# ---------------------------------------------------------------------------
# Pure-JAX reference (for correctness check)
# ---------------------------------------------------------------------------
def _ref_conv(x, w, padding):
    return lax.conv_general_dilated(x, w, (1, 1), padding,
                                    dimension_numbers=("NHWC", "HWIO", "NHWC"))


def _ref_cbr(x, cb, padding):
    y = _ref_conv(x, cb["w"], padding)
    return jnp.clip(y * cb["s"] + cb["b"], 0.0, 6.0)


def inception_a_reference(x_nchw, p):
    x = jnp.transpose(x_nchw, (0, 2, 3, 1))
    out1 = _ref_cbr(x, p["b1"], "VALID")
    out2 = _ref_cbr(_ref_cbr(x, p["b2a"], "VALID"), p["b2b"], ((1, 1), (1, 1)))
    t = _ref_cbr(x, p["b3a"], "VALID")
    t = _ref_cbr(t, p["b3b"], ((1, 1), (1, 1)))
    out3 = _ref_cbr(t, p["b3c"], ((1, 1), (1, 1)))
    cat = jnp.concatenate([out1, out2, out3], axis=-1)
    lin = _ref_conv(cat, p["lin_w"], "VALID") + p["lin_b"]
    if p["has_shortcut_proj"]:
        sc = _ref_conv(x, p["sc"]["w"], "VALID") * p["sc"]["s"] + p["sc"]["b"]
    else:
        sc = x
    out = jnp.maximum(lin + sc, 0.0)
    return jnp.transpose(out, (0, 3, 1, 2))


# ---------------------------------------------------------------------------
if __name__ == "__main__":
    # Small, shape-consistent configuration.
    N, in_channels, H, W = 2, 4, 16, 16
    b1, b2_1x1, b2_3x3 = 8, 4, 8
    b3_1x1, b3_3x3_1, b3_3x3_2 = 4, 8, 8
    n1_linear = 16  # != in_channels -> projection shortcut path is exercised

    key = jax.random.PRNGKey(0)
    kx, kparam = jax.random.split(key)
    x = jax.random.normal(kx, (N, in_channels, H, W), jnp.float32)  # NCHW like PyTorch
    params = init_params(kparam, in_channels, b1, b2_1x1, b2_3x3,
                         b3_1x1, b3_3x3_1, b3_3x3_2, n1_linear)

    ref = jax.block_until_ready(inception_a_reference(x, params))

    # f32 compute path: tight structural check of the fused kernel.
    kp32 = prepare_kernel_params(params, compute_dtype=jnp.float32)
    out32 = jax.block_until_ready(inception_a_forward(x, kp32))
    assert out32.shape == (N, n1_linear, H, W), out32.shape
    assert jnp.allclose(out32, ref, rtol=1e-4, atol=1e-4), \
        float(jnp.max(jnp.abs(out32 - ref)))

    # bf16 MXU path (default for v6e/v7x): tolerance reflects bf16 rounding.
    kp16 = prepare_kernel_params(params, compute_dtype=jnp.bfloat16)
    out16 = jax.block_until_ready(inception_a_forward(x, kp16))
    assert out16.shape == (N, n1_linear, H, W), out16.shape
    assert jnp.allclose(out16, ref, rtol=5e-2, atol=5e-2), \
        float(jnp.max(jnp.abs(out16 - ref)))

    print("KERNEL_OK")
</pallas_src>

<mosaic_0001>
module attributes {stable_mosaic.version = 11 : i64} {
  func.func @_inception_a_kernel(%arg0: i32, %arg1: memref<8x512xf32, #tpu.memory_space<vmem>>, %arg2: memref<72x512xf32, #tpu.memory_space<vmem>>, %arg3: memref<40x8xf32, #tpu.memory_space<vmem>>, %arg4: memref<40x1xf32, #tpu.memory_space<vmem>>, %arg5: memref<8x72xf32, #tpu.memory_space<vmem>>, %arg6: memref<8x1xf32, #tpu.memory_space<vmem>>, %arg7: memref<8x72xf32, #tpu.memory_space<vmem>>, %arg8: memref<8x1xf32, #tpu.memory_space<vmem>>, %arg9: memref<8x72xf32, #tpu.memory_space<vmem>>, %arg10: memref<8x1xf32, #tpu.memory_space<vmem>>, %arg11: memref<16x24xf32, #tpu.memory_space<vmem>>, %arg12: memref<16x1xf32, #tpu.memory_space<vmem>>, %arg13: memref<16x512xf32, #tpu.memory_space<vmem>>) attributes {dimension_semantics = [#tpu.dimension_semantics<parallel>], iteration_bounds = array<i64: 1>, scalar_prefetch = 0 : i64, scratch_operands = 0 : i64, tpu.core_type = #tpu.core_type<tc>, window_params = [{transform_indices = @transform_0, window_bounds = array<i64: 8, 512>}, {pipeline_mode = #tpu.pipeline_mode<synchronous>, transform_indices = @transform_1, window_bounds = array<i64: 72, 512>}, {pipeline_mode = #tpu.pipeline_mode<synchronous>, transform_indices = @transform_2, window_bounds = array<i64: 40, 8>}, {pipeline_mode = #tpu.pipeline_mode<synchronous>, transform_indices = @transform_3, window_bounds = array<i64: 40, 1>}, {pipeline_mode = #tpu.pipeline_mode<synchronous>, transform_indices = @transform_4, window_bounds = array<i64: 8, 72>}, {pipeline_mode = #tpu.pipeline_mode<synchronous>, transform_indices = @transform_5, window_bounds = array<i64: 8, 1>}, {pipeline_mode = #tpu.pipeline_mode<synchronous>, transform_indices = @transform_6, window_bounds = array<i64: 8, 72>}, {pipeline_mode = #tpu.pipeline_mode<synchronous>, transform_indices = @transform_7, window_bounds = array<i64: 8, 1>}, {pipeline_mode = #tpu.pipeline_mode<synchronous>, transform_indices = @transform_8, window_bounds = array<i64: 8, 72>}, {pipeline_mode = #tpu.pipeline_mode<synchronous>, transform_indices = @transform_9, window_bounds = array<i64: 8, 1>}, {pipeline_mode = #tpu.pipeline_mode<synchronous>, transform_indices = @transform_10, window_bounds = array<i64: 16, 24>}, {pipeline_mode = #tpu.pipeline_mode<synchronous>, transform_indices = @transform_11, window_bounds = array<i64: 16, 1>}, {transform_indices = @transform_12, window_bounds = array<i64: 16, 512>}]} {
    %c0 = arith.constant 0 : index
    %c0_0 = arith.constant 0 : index
    %0 = vector.load %arg1[%c0, %c0_0] : memref<8x512xf32, #tpu.memory_space<vmem>>, vector<8x512xf32>
    %c0_1 = arith.constant 0 : index
    %c0_2 = arith.constant 0 : index
    %1 = vector.load %arg2[%c0_1, %c0_2] : memref<72x512xf32, #tpu.memory_space<vmem>>, vector<72x512xf32>
    %c0_3 = arith.constant 0 : index
    %c0_4 = arith.constant 0 : index
    %2 = vector.load %arg3[%c0_3, %c0_4] : memref<40x8xf32, #tpu.memory_space<vmem>>, vector<40x8xf32>
    %cst = arith.constant dense<0.000000e+00> : vector<40x512xf32>
    %3 = tpu.matmul %2, %0, %cst {dimension_numbers = #tpu.dot_dimension_numbers<[1], [0], [0], [1], [0, 0, 1, 1], [], []>} : vector<40x8xf32>, vector<8x512xf32>, vector<40x512xf32> -> vector<40x512xf32>
    %c0_5 = arith.constant 0 : index
    %c0_6 = arith.constant 0 : index
    %4 = vector.load %arg4[%c0_5, %c0_6] : memref<40x1xf32, #tpu.memory_space<vmem>>, vector<40x1xf32>
    %5 = vector.broadcast %4 : vector<40x1xf32> to vector<40x512xf32>
    %6 = arith.addf %3, %5 : vector<40x512xf32>
    %cst_7 = arith.constant 0.000000e+00 : f32
    %cst_8 = arith.constant 6.000000e+00 : f32
    %7 = vector.broadcast %cst_7 : f32 to vector<40x512xf32>
    %8 = arith.maximumf %7, %6 : vector<40x512xf32>
    %9 = vector.broadcast %cst_8 : f32 to vector<40x512xf32>
    %10 = arith.minimumf %9, %8 : vector<40x512xf32>
    %11 = vector.extract_strided_slice %10 {offsets = [0, 0], sizes = [8, 512], strides = [1, 1]} : vector<40x512xf32> to vector<8x512xf32>
    %12 = vector.extract_strided_slice %10 {offsets = [8, 0], sizes = [8, 512], strides = [1, 1]} : vector<40x512xf32> to vector<8x512xf32>
    %13 = vector.extract_strided_slice %10 {offsets = [16, 0], sizes = [8, 512], strides = [1, 1]} : vector<40x512xf32> to vector<8x512xf32>
    %14 = vector.extract_strided_slice %6 {offsets = [24, 0], sizes = [16, 512], strides = [1, 1]} : vector<40x512xf32> to vector<16x512xf32>
    %c17_i32 = arith.constant 17 : i32
    %15 = tpu.dynamic_rotate %12 by %c17_i32 dim 1 : vector<8x512xf32>, i32 -> vector<8x512xf32>
    %c16_i32 = arith.constant 16 : i32
    %16 = tpu.dynamic_rotate %12 by %c16_i32 dim 1 : vector<8x512xf32>, i32 -> vector<8x512xf32>
    %c15_i32 = arith.constant 15 : i32
    %17 = tpu.dynamic_rotate %12 by %c15_i32 dim 1 : vector<8x512xf32>, i32 -> vector<8x512xf32>
    %c1_i32 = arith.constant 1 : i32
    %18 = tpu.dynamic_rotate %12 by %c1_i32 dim 1 : vector<8x512xf32>, i32 -> vector<8x512xf32>
    %c511_i32 = arith.constant 511 : i32
    %19 = tpu.dynamic_rotate %12 by %c511_i32 dim 1 : vector<8x512xf32>, i32 -> vector<8x512xf32>
    %c497_i32 = arith.constant 497 : i32
    %20 = tpu.dynamic_rotate %12 by %c497_i32 dim 1 : vector<8x512xf32>, i32 -> vector<8x512xf32>
    %c496_i32 = arith.constant 496 : i32
    %21 = tpu.dynamic_rotate %12 by %c496_i32 dim 1 : vector<8x512xf32>, i32 -> vector<8x512xf32>
    %c495_i32 = arith.constant 495 : i32
    %22 = tpu.dynamic_rotate %12 by %c495_i32 dim 1 : vector<8x512xf32>, i32 -> vector<8x512xf32>
    %23 = tpu.concatenate %15, %16, %17, %18, %12, %19, %20, %21, %22 in 0 : vector<8x512xf32>, vector<8x512xf32>, vector<8x512xf32>, vector<8x512xf32>, vector<8x512xf32>, vector<8x512xf32>, vector<8x512xf32>, vector<8x512xf32>, vector<8x512xf32> -> vector<72x512xf32>
    %24 = arith.mulf %23, %1 : vector<72x512xf32>
    %c0_9 = arith.constant 0 : index
    %c0_10 = arith.constant 0 : index
    %25 = vector.load %arg5[%c0_9, %c0_10] : memref<8x72xf32, #tpu.memory_space<vmem>>, vector<8x72xf32>
    %cst_11 = arith.constant dense<0.000000e+00> : vector<8x512xf32>
    %26 = tpu.matmul %25, %24, %cst_11 {dimension_numbers = #tpu.dot_dimension_numbers<[1], [0], [0], [1], [0, 0, 1, 1], [], []>} : vector<8x72xf32>, vector<72x512xf32>, vector<8x512xf32> -> vector<8x512xf32>
    %c0_12 = arith.constant 0 : index
    %c0_13 = arith.constant 0 : index
    %27 = vector.load %arg6[%c0_12, %c0_13] : memref<8x1xf32, #tpu.memory_space<vmem>>, vector<8x1xf32>
    %28 = vector.broadcast %27 : vector<8x1xf32> to vector<8x512xf32>
    %29 = arith.addf %26, %28 : vector<8x512xf32>
    %cst_14 = arith.constant 0.000000e+00 : f32
    %cst_15 = arith.constant 6.000000e+00 : f32
    %30 = vector.broadcast %cst_14 : f32 to vector<8x512xf32>
    %31 = arith.maximumf %30, %29 : vector<8x512xf32>
    %32 = vector.broadcast %cst_15 : f32 to vector<8x512xf32>
    %33 = arith.minimumf %32, %31 : vector<8x512xf32>
    %c17_i32_16 = arith.constant 17 : i32
    %34 = tpu.dynamic_rotate %13 by %c17_i32_16 dim 1 : vector<8x512xf32>, i32 -> vector<8x512xf32>
    %c16_i32_17 = arith.constant 16 : i32
    %35 = tpu.dynamic_rotate %13 by %c16_i32_17 dim 1 : vector<8x512xf32>, i32 -> vector<8x512xf32>
    %c15_i32_18 = arith.constant 15 : i32
    %36 = tpu.dynamic_rotate %13 by %c15_i32_18 dim 1 : vector<8x512xf32>, i32 -> vector<8x512xf32>
    %c1_i32_19 = arith.constant 1 : i32
    %37 = tpu.dynamic_rotate %13 by %c1_i32_19 dim 1 : vector<8x512xf32>, i32 -> vector<8x512xf32>
    %c511_i32_20 = arith.constant 511 : i32
    %38 = tpu.dynamic_rotate %13 by %c511_i32_20 dim 1 : vector<8x512xf32>, i32 -> vector<8x512xf32>
    %c497_i32_21 = arith.constant 497 : i32
    %39 = tpu.dynamic_rotate %13 by %c497_i32_21 dim 1 : vector<8x512xf32>, i32 -> vector<8x512xf32>
    %c496_i32_22 = arith.constant 496 : i32
    %40 = tpu.dynamic_rotate %13 by %c496_i32_22 dim 1 : vector<8x512xf32>, i32 -> vector<8x512xf32>
    %c495_i32_23 = arith.constant 495 : i32
    %41 = tpu.dynamic_rotate %13 by %c495_i32_23 dim 1 : vector<8x512xf32>, i32 -> vector<8x512xf32>
    %42 = tpu.concatenate %34, %35, %36, %37, %13, %38, %39, %40, %41 in 0 : vector<8x512xf32>, vector<8x512xf32>, vector<8x512xf32>, vector<8x512xf32>, vector<8x512xf32>, vector<8x512xf32>, vector<8x512xf32>, vector<8x512xf32>, vector<8x512xf32> -> vector<72x512xf32>
    %43 = arith.mulf %42, %1 : vector<72x512xf32>
    %c0_24 = arith.constant 0 : index
    %c0_25 = arith.constant 0 : index
    %44 = vector.load %arg7[%c0_24, %c0_25] : memref<8x72xf32, #tpu.memory_space<vmem>>, vector<8x72xf32>
    %cst_26 = arith.constant dense<0.000000e+00> : vector<8x512xf32>
    %45 = tpu.matmul %44, %43, %cst_26 {dimension_numbers = #tpu.dot_dimension_numbers<[1], [0], [0], [1], [0, 0, 1, 1], [], []>} : vector<8x72xf32>, vector<72x512xf32>, vector<8x512xf32> -> vector<8x512xf32>
    %c0_27 = arith.constant 0 : index
    %c0_28 = arith.constant 0 : index
    %46 = vector.load %arg8[%c0_27, %c0_28] : memref<8x1xf32, #tpu.memory_space<vmem>>, vector<8x1xf32>
    %47 = vector.broadcast %46 : vector<8x1xf32> to vector<8x512xf32>
    %48 = arith.addf %45, %47 : vector<8x512xf32>
    %cst_29 = arith.constant 0.000000e+00 : f32
    %cst_30 = arith.constant 6.000000e+00 : f32
    %49 = vector.broadcast %cst_29 : f32 to vector<8x512xf32>
    %50 = arith.maximumf %49, %48 : vector<8x512xf32>
    %51 = vector.broadcast %cst_30 : f32 to vector<8x512xf32>
    %52 = arith.minimumf %51, %50 : vector<8x512xf32>
    %c17_i32_31 = arith.constant 17 : i32
    %53 = tpu.dynamic_rotate %52 by %c17_i32_31 dim 1 : vector<8x512xf32>, i32 -> vector<8x512xf32>
    %c16_i32_32 = arith.constant 16 : i32
    %54 = tpu.dynamic_rotate %52 by %c16_i32_32 dim 1 : vector<8x512xf32>, i32 -> vector<8x512xf32>
    %c15_i32_33 = arith.constant 15 : i32
    %55 = tpu.dynamic_rotate %52 by %c15_i32_33 dim 1 : vector<8x512xf32>, i32 -> vector<8x512xf32>
    %c1_i32_34 = arith.constant 1 : i32
    %56 = tpu.dynamic_rotate %52 by %c1_i32_34 dim 1 : vector<8x512xf32>, i32 -> vector<8x512xf32>
    %c511_i32_35 = arith.constant 511 : i32
    %57 = tpu.dynamic_rotate %52 by %c511_i32_35 dim 1 : vector<8x512xf32>, i32 -> vector<8x512xf32>
    %c497_i32_36 = arith.constant 497 : i32
    %58 = tpu.dynamic_rotate %52 by %c497_i32_36 dim 1 : vector<8x512xf32>, i32 -> vector<8x512xf32>
    %c496_i32_37 = arith.constant 496 : i32
    %59 = tpu.dynamic_rotate %52 by %c496_i32_37 dim 1 : vector<8x512xf32>, i32 -> vector<8x512xf32>
    %c495_i32_38 = arith.constant 495 : i32
    %60 = tpu.dynamic_rotate %52 by %c495_i32_38 dim 1 : vector<8x512xf32>, i32 -> vector<8x512xf32>
    %61 = tpu.concatenate %53, %54, %55, %56, %52, %57, %58, %59, %60 in 0 : vector<8x512xf32>, vector<8x512xf32>, vector<8x512xf32>, vector<8x512xf32>, vector<8x512xf32>, vector<8x512xf32>, vector<8x512xf32>, vector<8x512xf32>, vector<8x512xf32> -> vector<72x512xf32>
    %62 = arith.mulf %61, %1 : vector<72x512xf32>
    %c0_39 = arith.constant 0 : index
    %c0_40 = arith.constant 0 : index
    %63 = vector.load %arg9[%c0_39, %c0_40] : memref<8x72xf32, #tpu.memory_space<vmem>>, vector<8x72xf32>
    %cst_41 = arith.constant dense<0.000000e+00> : vector<8x512xf32>
    %64 = tpu.matmul %63, %62, %cst_41 {dimension_numbers = #tpu.dot_dimension_numbers<[1], [0], [0], [1], [0, 0, 1, 1], [], []>} : vector<8x72xf32>, vector<72x512xf32>, vector<8x512xf32> -> vector<8x512xf32>
    %c0_42 = arith.constant 0 : index
    %c0_43 = arith.constant 0 : index
    %65 = vector.load %arg10[%c0_42, %c0_43] : memref<8x1xf32, #tpu.memory_space<vmem>>, vector<8x1xf32>
    %66 = vector.broadcast %65 : vector<8x1xf32> to vector<8x512xf32>
    %67 = arith.addf %64, %66 : vector<8x512xf32>
    %cst_44 = arith.constant 0.000000e+00 : f32
    %cst_45 = arith.constant 6.000000e+00 : f32
    %68 = vector.broadcast %cst_44 : f32 to vector<8x512xf32>
    %69 = arith.maximumf %68, %67 : vector<8x512xf32>
    %70 = vector.broadcast %cst_45 : f32 to vector<8x512xf32>
    %71 = arith.minimumf %70, %69 : vector<8x512xf32>
    %72 = tpu.concatenate %11, %33, %71 in 0 : vector<8x512xf32>, vector<8x512xf32>, vector<8x512xf32> -> vector<24x512xf32>
    %c0_46 = arith.constant 0 : index
    %c0_47 = arith.constant 0 : index
    %73 = vector.load %arg11[%c0_46, %c0_47] : memref<16x24xf32, #tpu.memory_space<vmem>>, vector<16x24xf32>
    %cst_48 = arith.constant dense<0.000000e+00> : vector<16x512xf32>
    %74 = tpu.matmul %73, %72, %cst_48 {dimension_numbers = #tpu.dot_dimension_numbers<[1], [0], [0], [1], [0, 0, 1, 1], [], []>} : vector<16x24xf32>, vector<24x512xf32>, vector<16x512xf32> -> vector<16x512xf32>
    %c0_49 = arith.constant 0 : index
    %c0_50 = arith.constant 0 : index
    %75 = vector.load %arg12[%c0_49, %c0_50] : memref<16x1xf32, #tpu.memory_space<vmem>>, vector<16x1xf32>
    %76 = vector.broadcast %75 : vector<16x1xf32> to vector<16x512xf32>
    %77 = arith.addf %74, %76 : vector<16x512xf32>
    %78 = arith.addf %77, %14 : vector<16x512xf32>
    %cst_51 = arith.constant 0.000000e+00 : f32
    %79 = vector.broadcast %cst_51 : f32 to vector<16x512xf32>
    %80 = arith.maximumf %78, %79 : vector<16x512xf32>
    %c0_52 = arith.constant 0 : index
    %c0_53 = arith.constant 0 : index
    %81 = vector.load %arg13[%c0_52, %c0_53] : memref<16x512xf32, #tpu.memory_space<vmem>>, vector<16x512xf32>
    tpu.vector_store %arg13[%c0_52, %c0_53], %80 {strides = array<i32>} : memref<16x512xf32, #tpu.memory_space<vmem>>, vector<16x512xf32>,
    return
  }
  func.func @transform_0(%arg0: i32) -> (i32, i32) {
    %c0_i32 = arith.constant 0 : i32
    %c0_i32_0 = arith.constant 0 : i32
    return %c0_i32, %arg0 : i32, i32
  }
  func.func @transform_1(%arg0: i32) -> (i32, i32) {
    %c0_i32 = arith.constant 0 : i32
    %c0_i32_0 = arith.constant 0 : i32
    %c0_i32_1 = arith.constant 0 : i32
    return %c0_i32, %c0_i32_0 : i32, i32
  }
  func.func @transform_2(%arg0: i32) -> (i32, i32) {
    %c0_i32 = arith.constant 0 : i32
    %c0_i32_0 = arith.constant 0 : i32
    %c0_i32_1 = arith.constant 0 : i32
    return %c0_i32, %c0_i32_0 : i32, i32
  }
  func.func @transform_3(%arg0: i32) -> (i32, i32) {
    %c0_i32 = arith.constant 0 : i32
    %c0_i32_0 = arith.constant 0 : i32
    %c0_i32_1 = arith.constant 0 : i32
    return %c0_i32, %c0_i32_0 : i32, i32
  }
  func.func @transform_4(%arg0: i32) -> (i32, i32) {
    %c0_i32 = arith.constant 0 : i32
    %c0_i32_0 = arith.constant 0 : i32
    %c0_i32_1 = arith.constant 0 : i32
    return %c0_i32, %c0_i32_0 : i32, i32
  }
  func.func @transform_5(%arg0: i32) -> (i32, i32) {
    %c0_i32 = arith.constant 0 : i32
    %c0_i32_0 = arith.constant 0 : i32
    %c0_i32_1 = arith.constant 0 : i32
    return %c0_i32, %c0_i32_0 : i32, i32
  }
  func.func @transform_6(%arg0: i32) -> (i32, i32) {
    %c0_i32 = arith.constant 0 : i32
    %c0_i32_0 = arith.constant 0 : i32
    %c0_i32_1 = arith.constant 0 : i32
    return %c0_i32, %c0_i32_0 : i32, i32
  }
  func.func @transform_7(%arg0: i32) -> (i32, i32) {
    %c0_i32 = arith.constant 0 : i32
    %c0_i32_0 = arith.constant 0 : i32
    %c0_i32_1 = arith.constant 0 : i32
    return %c0_i32, %c0_i32_0 : i32, i32
  }
  func.func @transform_8(%arg0: i32) -> (i32, i32) {
    %c0_i32 = arith.constant 0 : i32
    %c0_i32_0 = arith.constant 0 : i32
    %c0_i32_1 = arith.constant 0 : i32
    return %c0_i32, %c0_i32_0 : i32, i32
  }
  func.func @transform_9(%arg0: i32) -> (i32, i32) {
    %c0_i32 = arith.constant 0 : i32
    %c0_i32_0 = arith.constant 0 : i32
    %c0_i32_1 = arith.constant 0 : i32
    return %c0_i32, %c0_i32_0 : i32, i32
  }
  func.func @transform_10(%arg0: i32) -> (i32, i32) {
    %c0_i32 = arith.constant 0 : i32
    %c0_i32_0 = arith.constant 0 : i32
    %c0_i32_1 = arith.constant 0 : i32
    return %c0_i32, %c0_i32_0 : i32, i32
  }
  func.func @transform_11(%arg0: i32) -> (i32, i32) {
    %c0_i32 = arith.constant 0 : i32
    %c0_i32_0 = arith.constant 0 : i32
    %c0_i32_1 = arith.constant 0 : i32
    return %c0_i32, %c0_i32_0 : i32, i32
  }
  func.func @transform_12(%arg0: i32) -> (i32, i32) {
    %c0_i32 = arith.constant 0 : i32
    %c0_i32_0 = arith.constant 0 : i32
    return %c0_i32, %arg0 : i32, i32
  }
}

</mosaic_0001>

<bundles_post_ra>
// kernel: tpu_custom_call.1
= control target key start
LH: loop header
LB: loop body
LE: loop exit
PB: predicated region body
PF: predicated region fallthrough
CT: control target
= control target key end

     0   :  { %17 = vsyncpa [#allocation3], 0  ;;  %s3020_s0 = inlined_call_operand.hbm [shape: f32[8,512], index: 0, kind: input, shape index: {}]   ;;  %s3021_s1 = inlined_call_operand.hbm [shape: f32[72,512], index: 1, kind: input, shape index: {}]   ;;  %s3022_s2 = inlined_call_operand.hbm [shape: f32[40,8], index: 2, kind: input, shape index: {}]   ;;  %s3023_s3 = inlined_call_operand.hbm [shape: f32[40,1], index: 3, kind: input, shape index: {}]   ;;  %s3024_s4 = inlined_call_operand.hbm [shape: f32[8,72], index: 4, kind: input, shape index: {}]   ;;  %s3025_s5 = inlined_call_operand.hbm [shape: f32[8,1], index: 5, kind: input, shape index: {}]   ;;  %s3026_s6 = inlined_call_operand.hbm [shape: f32[8,72], index: 6, kind: input, shape index: {}]   ;;  %s3027_s7 = inlined_call_operand.hbm [shape: f32[8,1], index: 7, kind: input, shape index: {}]   ;;  %s3028_s8 = inlined_call_operand.hbm [shape: f32[8,72], index: 8, kind: input, shape index: {}]   ;;  %s3029_s9 = inlined_call_operand.hbm [shape: f32[8,1], index: 9, kind: input, shape index: {}]   ;;  %s3030_s10 = inlined_call_operand.hbm [shape: f32[16,24], index: 10, kind: input, shape index: {}]   ;;  %s3031_s11 = inlined_call_operand.hbm [shape: f32[16,1], index: 11, kind: input, shape index: {}]   ;;  %s3032_s12 = inlined_call_operand.hbm [shape: f32[16,512], index: 12, kind: output, shape index: {}]  }
   0x1   :  { %18 = vsyncpa [#allocation6], 0 }
   0x2   :  { %19 = vsyncpa [#allocation9], 0 }
   0x3   :  { %20 = vsyncpa [#allocation12], 0 }
   0x4   :  { %21 = vsyncpa [#allocation15], 0 }
   0x5   :  { %22 = vsyncpa [#allocation18], 0 }
   0x6   :  { %23 = vsyncpa [#allocation21], 0 }
   0x7   :  { %24 = vsyncpa [#allocation4], 0  ;;  %s2084_s21 = smov [#allocation5]   ;;  %s1782_s25 = scalar_lea.hbm %s3021_s1, 4608 }
   0x8   :  { %s40_s22 = sshll.u32 %s2084_s21, 4  ;;  %p1783_p0 = scmp.ne.s32.totalorder %s3021_s1, %s1782_s25  ;;  %s41_s22 = int_to_ptr.vmem [resolvable:$true] %s40_s22 }
   0x9   :  { %p1786_p1 = scmp.lt.u32.totalorder %s1782_s25, %s3021_s1 }
   0xb   :  { %p1788_p2 = pnand %p1786_p1, %p1783_p0 }
   0xd   :  { %1791 = shalt.err (!%p1788_p2)
}
   0xe   :  { %s1792_s30 = scalar_lea.vmem %s41_s22, 4608  ;;  %p1797_p4 = scmp.lt.s32.totalorder %s41_s22, %s41_s22 }
   0xf   :  { %p1793_p3 = scmp.ne.s32.totalorder %s41_s22, %s1792_s30  ;;  %p1798_p5 = scmp.lt.s32.totalorder %s1792_s30, %s1792_s30 }
  0x11   :  { %p1799_p6 = por %p1798_p5, %p1797_p4 }
  0x13   :  { %p1800_p7 = pnand %p1799_p6, %p1793_p3 }
  0x15   :  { %1803 = shalt.err (!%p1800_p7)
}
  0x16   :  { %s2085_s13 = smov 512   ;;  %s2086_s14 = smov 32  }
  0x17   :  { %46 = dma.hbm_to_vmem [thread:$0]  %s3021_s1, 4608, %s41_s22, [#allocation6], %s2085_s13, %s2085_s13, %s2086_s14  }
  0x18   :  { %s2087_s17 = smov [#allocation8]   ;;  %s2088_s19 = smov [#allocation11]  }
  0x19   :  { %s64_s18 = sshll.u32 %s2087_s17, 4  ;;  %s87_s20 = sshll.u32 %s2088_s19, 4  ;;  %s65_s18 = int_to_ptr.vmem [resolvable:$true] %s64_s18  ;;  %s88_s20 = int_to_ptr.vmem [resolvable:$true] %s87_s20 }
  0x1a   :  { %s1804_s24 = scalar_lea.hbm %s3023_s3, 640 }
  0x1b   :  { %p1805_p8 = scmp.ne.s32.totalorder %s3023_s3, %s1804_s24  ;;  %p1808_p9 = scmp.lt.u32.totalorder %s1804_s24, %s3023_s3 }
  0x1d   :  { %p1810_p10 = pnand %p1808_p9, %p1805_p8 }
  0x1f   :  { %1813 = shalt.err (!%p1810_p10)
}
  0x20   :  { %s1814_s1 = scalar_lea.vmem %s65_s18, 640  ;;  %p1819_p12 = scmp.lt.s32.totalorder %s65_s18, %s65_s18 }
  0x21   :  { %p1815_p11 = scmp.ne.s32.totalorder %s65_s18, %s1814_s1  ;;  %p1820_p13 = scmp.lt.s32.totalorder %s1814_s1, %s1814_s1 }
  0x23   :  { %p1821_p0 = por %p1820_p13, %p1819_p12 }
  0x25   :  { %p1822_p1 = pnand %p1821_p0, %p1815_p11 }
  0x27   :  { %1825 = shalt.err (!%p1822_p1)
}
  0x28   :  { %s2089_s22 = smov 128   ;;  %s2090_s29 = smov 8  }
  0x29   :  { %70 = dma.hbm_to_vmem [thread:$0]  %s3023_s3, 640, %s65_s18, [#allocation9], %s2089_s22, %s2089_s22, %s2090_s29  }
  0x2a   :  { %s1826_s19 = scalar_lea.hbm %s3025_s5, 128 }
  0x2b   :  { %p1827_p2 = scmp.ne.s32.totalorder %s3025_s5, %s1826_s19  ;;  %p1830_p3 = scmp.lt.u32.totalorder %s1826_s19, %s3025_s5 }
  0x2d   :  { %p1832_p4 = pnand %p1830_p3, %p1827_p2 }
  0x2f   :  { %1835 = shalt.err (!%p1832_p4)
}
  0x30   :  { %s1836_s26 = scalar_lea.vmem %s88_s20, 128  ;;  %p1841_p6 = scmp.lt.s32.totalorder %s88_s20, %s88_s20 }
  0x31   :  { %p1837_p5 = scmp.ne.s32.totalorder %s88_s20, %s1836_s26  ;;  %p1842_p7 = scmp.lt.s32.totalorder %s1836_s26, %s1836_s26 }
  0x33   :  { %p1843_p8 = por %p1842_p7, %p1841_p6 }
  0x35   :  { %p1844_p9 = pnand %p1843_p8, %p1837_p5 }
  0x37   :  { %1847 = shalt.err (!%p1844_p9)
}
  0x38   :  { %90 = dma.hbm_to_vmem [thread:$0]  %s3025_s5, 128, %s88_s20, [#allocation12]  }
  0x39   :  { %s2091_s27 = smov [#allocation14]   ;;  %s2092_s1 = smov [#allocation17]  }
  0x3a   :  { %s107_s28 = sshll.u32 %s2091_s27, 4  ;;  %s127_s30 = sshll.u32 %s2092_s1, 4  ;;  %s108_s28 = int_to_ptr.vmem [resolvable:$true] %s107_s28  ;;  %s128_s30 = int_to_ptr.vmem [resolvable:$true] %s127_s30 }
  0x3b   :  { %s1848_s17 = scalar_lea.hbm %s3027_s7, 128 }
  0x3c   :  { %p1849_p10 = scmp.ne.s32.totalorder %s3027_s7, %s1848_s17  ;;  %p1852_p11 = scmp.lt.u32.totalorder %s1848_s17, %s3027_s7 }
  0x3e   :  { %p1854_p12 = pnand %p1852_p11, %p1849_p10 }
  0x40   :  { %1857 = shalt.err (!%p1854_p12)
}
  0x41   :  { %s1858_s5 = scalar_lea.vmem %s108_s28, 128  ;;  %p1863_p0 = scmp.lt.s32.totalorder %s108_s28, %s108_s28 }
  0x42   :  { %p1859_p13 = scmp.ne.s32.totalorder %s108_s28, %s1858_s5  ;;  %p1864_p1 = scmp.lt.s32.totalorder %s1858_s5, %s1858_s5 }
  0x44   :  { %p1865_p2 = por %p1864_p1, %p1863_p0 }
  0x46   :  { %p1866_p3 = pnand %p1865_p2, %p1859_p13 }
  0x48   :  { %1869 = shalt.err (!%p1866_p3)
}
  0x49   :  { %110 = dma.hbm_to_vmem [thread:$0]  %s3027_s7, 128, %s108_s28, [#allocation15]  }
  0x4a   :  { %s1870_s18 = scalar_lea.hbm %s3029_s9, 128 }
  0x4b   :  { %p1871_p4 = scmp.ne.s32.totalorder %s3029_s9, %s1870_s18  ;;  %p1874_p5 = scmp.lt.u32.totalorder %s1870_s18, %s3029_s9 }
  0x4d   :  { %p1876_p6 = pnand %p1874_p5, %p1871_p4 }
  0x4f   :  { %1879 = shalt.err (!%p1876_p6)
}
  0x50   :  { %s1880_s17 = scalar_lea.vmem %s128_s30, 128  ;;  %p1885_p8 = scmp.lt.s32.totalorder %s128_s30, %s128_s30 }
  0x51   :  { %p1881_p7 = scmp.ne.s32.totalorder %s128_s30, %s1880_s17  ;;  %p1886_p9 = scmp.lt.s32.totalorder %s1880_s17, %s1880_s17 }
  0x53   :  { %p1887_p10 = por %p1886_p9, %p1885_p8 }
  0x55   :  { %p1888_p11 = pnand %p1887_p10, %p1881_p7 }
  0x57   :  { %1891 = shalt.err (!%p1888_p11)
}
  0x58   :  { %130 = dma.hbm_to_vmem [thread:$0]  %s3029_s9, 128, %s128_s30, [#allocation18]  }
  0x59   :  { %s2093_s19 = smov [#allocation2]   ;;  %s2094_s23 = smov [#allocation7]  }
  0x5a   :  { %s31_s21 = sshll.u32 %s2093_s19, 4  ;;  %s52_s24 = sshll.u32 %s2094_s23, 4  ;;  %s32_s21 = int_to_ptr.vmem [resolvable:$true] %s31_s21  ;;  %s53_s24 = int_to_ptr.vmem [resolvable:$true] %s52_s24 }
  0x5b   :  { %s1892_s25 = scalar_lea.hbm %s3020_s0, 512 }
  0x5c   :  { %p1893_p12 = scmp.ne.s32.totalorder %s3020_s0, %s1892_s25  ;;  %p1896_p13 = scmp.lt.u32.totalorder %s1892_s25, %s3020_s0 }
  0x5e   :  { %p1898_p0 = pnand %p1896_p13, %p1893_p12 }
  0x60   :  { %1901 = shalt.err (!%p1898_p0)
}
  0x61   :  { %s1902_s9 = scalar_lea.vmem %s32_s21, 512  ;;  %p1907_p2 = scmp.lt.s32.totalorder %s32_s21, %s32_s21 }
  0x62   :  { %p1903_p1 = scmp.ne.s32.totalorder %s32_s21, %s1902_s9  ;;  %p1908_p3 = scmp.lt.s32.totalorder %s1902_s9, %s1902_s9 }
  0x64   :  { %p1909_p4 = por %p1908_p3, %p1907_p2 }
  0x66   :  { %p1910_p5 = pnand %p1909_p4, %p1903_p1 }
  0x68   :  { %1913 = shalt.err (!%p1910_p5)
}
  0x69   :  { %34 = dma.hbm_to_vmem [thread:$0]  %s3020_s0, 512, %s32_s21, [#allocation3]  }
  0x6a   :  { %s1914_s17 = scalar_lea.hbm %s3022_s2, 640 }
  0x6b   :  { %p1915_p6 = scmp.ne.s32.totalorder %s3022_s2, %s1914_s17  ;;  %p1918_p7 = scmp.lt.u32.totalorder %s1914_s17, %s3022_s2 }
  0x6d   :  { %p1920_p8 = pnand %p1918_p7, %p1915_p6 }
  0x6f   :  { %1923 = shalt.err (!%p1920_p8)
}
  0x70   :  { %s1924_s5 = scalar_lea.vmem %s53_s24, 640  ;;  %p1929_p10 = scmp.lt.s32.totalorder %s53_s24, %s53_s24 }
  0x71   :  { %p1925_p9 = scmp.ne.s32.totalorder %s53_s24, %s1924_s5  ;;  %p1930_p11 = scmp.lt.s32.totalorder %s1924_s5, %s1924_s5 }
  0x73   :  { %p1931_p12 = por %p1930_p11, %p1929_p10 }
  0x75   :  { %p1932_p13 = pnand %p1931_p12, %p1925_p9 }
  0x77   :  { %1935 = shalt.err (!%p1932_p13)
}
  0x78   :  { %58 = dma.hbm_to_vmem [thread:$0]  %s3022_s2, 640, %s53_s24, [#allocation6], %s2089_s22, %s2089_s22, %s2090_s29  }
  0x79   :  { %s2095_s20 = smov [#allocation10]   ;;  %s2096_s26 = smov [#allocation13]  }
  0x7a   :  { %s77_s25 = sshll.u32 %s2095_s20, 4  ;;  %s97_s3 = sshll.u32 %s2096_s26, 4  ;;  %s78_s25 = int_to_ptr.vmem [resolvable:$true] %s77_s25  ;;  %s98_s3 = int_to_ptr.vmem [resolvable:$true] %s97_s3 }
  0x7b   :  { %s1936_s9 = scalar_lea.hbm %s3024_s4, 128 }
  0x7c   :  { %p1937_p0 = scmp.ne.s32.totalorder %s3024_s4, %s1936_s9  ;;  %p1940_p1 = scmp.lt.u32.totalorder %s1936_s9, %s3024_s4 }
  0x7e   :  { %p1942_p2 = pnand %p1940_p1, %p1937_p0 }
  0x80   :  { %1945 = shalt.err (!%p1942_p2)
}
  0x81   :  { %s1946_s2 = scalar_lea.vmem %s78_s25, 128  ;;  %p1951_p4 = scmp.lt.s32.totalorder %s78_s25, %s78_s25 }
  0x82   :  { %p1947_p3 = scmp.ne.s32.totalorder %s78_s25, %s1946_s2  ;;  %p1952_p5 = scmp.lt.s32.totalorder %s1946_s2, %s1946_s2 }
  0x84   :  { %p1953_p6 = por %p1952_p5, %p1951_p4 }
  0x86   :  { %p1954_p7 = pnand %p1953_p6, %p1947_p3 }
  0x88   :  { %1957 = shalt.err (!%p1954_p7)
}
  0x89   :  { %80 = dma.hbm_to_vmem [thread:$0]  %s3024_s4, 128, %s78_s25, [#allocation9]  }
  0x8a   :  { %s1958_s19 = scalar_lea.hbm %s3026_s6, 128 }
  0x8b   :  { %p1959_p8 = scmp.ne.s32.totalorder %s3026_s6, %s1958_s19  ;;  %p1962_p9 = scmp.lt.u32.totalorder %s1958_s19, %s3026_s6 }
  0x8d   :  { %p1964_p10 = pnand %p1962_p9, %p1959_p8 }
  0x8f   :  { %1967 = shalt.err (!%p1964_p10)
}
  0x90   :  { %s1968_s20 = scalar_lea.vmem %s98_s3, 128  ;;  %p1973_p12 = scmp.lt.s32.totalorder %s98_s3, %s98_s3 }
  0x91   :  { %p1969_p11 = scmp.ne.s32.totalorder %s98_s3, %s1968_s20  ;;  %p1974_p13 = scmp.lt.s32.totalorder %s1968_s20, %s1968_s20 }
  0x93   :  { %p1975_p0 = por %p1974_p13, %p1973_p12 }
  0x95   :  { %p1976_p1 = pnand %p1975_p0, %p1969_p11 }
  0x97   :  { %1979 = shalt.err (!%p1976_p1)
}
  0x98   :  { %100 = dma.hbm_to_vmem [thread:$0]  %s3026_s6, 128, %s98_s3, [#allocation12]  }
  0x99   :  { %s2097_s26 = smov [#allocation16]   ;;  %s2098_s27 = smov [#allocation19]  }
  0x9a   :  { %s117_s18 = sshll.u32 %s2097_s26, 4  ;;  %s136_s9 = sshll.u32 %s2098_s27, 4  ;;  %s118_s18 = int_to_ptr.vmem [resolvable:$true] %s117_s18  ;;  %s137_s9 = int_to_ptr.vmem [resolvable:$true] %s136_s9 }
  0x9b   :  { %s1980_s15 = scalar_lea.hbm %s3028_s8, 128 }
  0x9c   :  { %p1981_p2 = scmp.ne.s32.totalorder %s3028_s8, %s1980_s15  ;;  %p1984_p3 = scmp.lt.u32.totalorder %s1980_s15, %s3028_s8 }
  0x9e   :  { %p1986_p4 = pnand %p1984_p3, %p1981_p2 }
  0xa0   :  { %1989 = shalt.err (!%p1986_p4)
}
  0xa1   :  { %s1990_s6 = scalar_lea.vmem %s118_s18, 128  ;;  %p1995_p6 = scmp.lt.s32.totalorder %s118_s18, %s118_s18 }
  0xa2   :  { %p1991_p5 = scmp.ne.s32.totalorder %s118_s18, %s1990_s6  ;;  %p1996_p7 = scmp.lt.s32.totalorder %s1990_s6, %s1990_s6 }
  0xa4   :  { %p1997_p8 = por %p1996_p7, %p1995_p6 }
  0xa6   :  { %p1998_p9 = pnand %p1997_p8, %p1991_p5 }
  0xa8   :  { %2001 = shalt.err (!%p1998_p9)
}
  0xa9   :  { %120 = dma.hbm_to_vmem [thread:$0]  %s3028_s8, 128, %s118_s18, [#allocation15]  }
  0xaa   :  { %s2002_s23 = scalar_lea.hbm %s3030_s10, 256 }
  0xab   :  { %p2003_p10 = scmp.ne.s32.totalorder %s3030_s10, %s2002_s23  ;;  %p2006_p11 = scmp.lt.u32.totalorder %s2002_s23, %s3030_s10 }
  0xad   :  { %p2008_p12 = pnand %p2006_p11, %p2003_p10 }
  0xaf   :  { %2011 = shalt.err (!%p2008_p12)
}
  0xb0   :  { %s2012_s4 = scalar_lea.vmem %s137_s9, 256  ;;  %p2017_p0 = scmp.lt.s32.totalorder %s137_s9, %s137_s9 }
  0xb1   :  { %p2013_p13 = scmp.ne.s32.totalorder %s137_s9, %s2012_s4  ;;  %p2018_p1 = scmp.lt.s32.totalorder %s2012_s4, %s2012_s4 }
  0xb3   :  { %p2019_p2 = por %p2018_p1, %p2017_p0 }
  0xb5   :  { %p2020_p3 = pnand %p2019_p2, %p2013_p13 }
  0xb7   :  { %2023 = shalt.err (!%p2020_p3)
}
  0xb8   :  { %142 = dma.hbm_to_vmem [thread:$0]  %s3030_s10, 256, %s137_s9, [#allocation18], %s2089_s22, %s2089_s22, %s2090_s29  }
  0xb9   :  { %s2099_s26 = smov [#allocation20]   ;;  %s2024_s1 = scalar_lea.hbm %s3031_s11, 256 }
  0xba   :  { %s148_s18 = sshll.u32 %s2099_s26, 4  ;;  %p2025_p4 = scmp.ne.s32.totalorder %s3031_s11, %s2024_s1  ;;  %s149_s18 = int_to_ptr.vmem [resolvable:$true] %s148_s18 }
  0xbb   :  { %p2028_p5 = scmp.lt.u32.totalorder %s2024_s1, %s3031_s11 }
  0xbd   :  { %p2030_p6 = pnand %p2028_p5, %p2025_p4 }
  0xbf   :  { %2033 = shalt.err (!%p2030_p6)
}
  0xc0   :  { %s2034_s17 = scalar_lea.vmem %s149_s18, 256  ;;  %p2039_p8 = scmp.lt.s32.totalorder %s149_s18, %s149_s18 }
  0xc1   :  { %p2035_p7 = scmp.ne.s32.totalorder %s149_s18, %s2034_s17  ;;  %p2040_p9 = scmp.lt.s32.totalorder %s2034_s17, %s2034_s17 }
  0xc3   :  { %p2041_p10 = por %p2040_p9, %p2039_p8 }
  0xc5   :  { %p2042_p11 = pnand %p2041_p10, %p2035_p7 }
  0xc7   :  { %2045 = shalt.err (!%p2042_p11)
}
  0xc8   :  { %154 = dma.hbm_to_vmem [thread:$0]  %s3031_s11, 256, %s149_s18, [#allocation21], %s2089_s22, %s2089_s22, %s2090_s29  }
  0xc9   :  { %2068 = dma.done.wait [#allocation3], 512  }
  0xca   :  { %2069 = vsyncadd [#allocation3], 4294966784 }
  0xcb   :  { %2070 = dma.done.wait [#allocation6], 5248  }
  0xcc   :  { %2071 = vsyncadd [#allocation6], 4294962048 }
  0xcd   :  { %2072 = dma.done.wait [#allocation9], 768  }
  0xce   :  { %2073 = vsyncadd [#allocation9], 4294966528 }
  0xcf   :  { %2074 = dma.done.wait [#allocation12], 256  }
  0xd0   :  { %2075 = vsyncadd [#allocation12], 4294967040 }
  0xd1   :  { %2076 = dma.done.wait [#allocation15], 256  }
  0xd2   :  { %2077 = vsyncadd [#allocation15], 4294967040 }
  0xd3   :  { %2078 = dma.done.wait [#allocation18], 384  }
  0xd4   :  { %2079 = vsyncadd [#allocation18], 4294966912 }
  0xd5   :  { %2080 = dma.done.wait [#allocation21], 256  }
  0xd6   :  { %2081 = vsyncadd [#allocation21], 4294967040  ;;  %v3033_v0 = vmov 0.0   ;;  %v2101_v1 = vmov 0   ;;  %v192_v2 = vld [vmem:[#allocation2 + $0x8] sm:$0xff]  ;;  %v194_v3 = vld [vmem:[#allocation2 + $0x18] sm:$0xff]  ;;  %v504_v53 = vlaneseq }
  0xd7   :  { %346 = vmatprep.mubr.f32.mxu0 %v3033_v0  ;;  %441 = vmatprep.mubr.f32.mxu1 %v3033_v0  ;;  %v191_v4 = vld [vmem:[#allocation2] sm:$0xff]  ;;  %vm266_vm0 = vcmask 64512   ;;  %v193_v5 = vld [vmem:[#allocation2 + $0x10] sm:$0xff]  ;;  %v232_v8 = vld [vmem:[#allocation7 + $0x8] sm:$0xff]  ;;  %s2102_s11 = smov 17   ;;  %s2103_s22 = smov 16  }
  0xd8   :  { %1780 = vset.pattern.permute.xlu0 %v2101_v1  ;;  %1781 = vset.pattern.permute.xlu1 %v2101_v1  ;;  %v231_v6 = vld [vmem:[#allocation7] sm:$0xff]  ;;  %v237_v7 = vld [vmem:[#allocation8 + $0x8] sm:$0xff]  ;;  %v238_v9 = vld [vmem:[#allocation8 + $0x10] sm:$0xff]  ;;  %s2104_s29 = smov 15   ;;  %s2105_s6 = smov 1   ;;  %v2501_v55 = vand.u32 127, %v504_v53 }
  0xd9   :  { %282 = vmatprep.subr.mxu0 %v192_v2  ;;  %377 = vmatprep.subr.mxu1 %v194_v3  ;;  %v233_v10 = vld [vmem:[#allocation7 + $0x10] sm:$0xff]  ;;  %s2106_s3 = smov 127   ;;  %s2107_s7 = smov 113   ;;  %v234_v46 = vld [vmem:[#allocation7 + $0x18] sm:$0xff]  ;;  %v235_v49 = vld [vmem:[#allocation7 + $0x20] sm:$0xff]  ;;  %vm645_vm9 = vcmask 588800  }
  0xda   :  { %283 = vmatpush1.msra.mxu0 %v191_v4  ;;  %378 = vmatpush1.msra.mxu1 %v193_v5  ;;  %s2108_s28 = smov 112   ;;  %s2109_s19 = smov 111   ;;  %v932_v57 = vld [vmem:[#allocation14] sm:$0xff]  ;;  %vm506_vm1 = vcmp.lt.s32.totalorder %v2501_v55, 17  ;;  %vm519_vm2 = vcmp.lt.s32.totalorder %v2501_v55, 16  ;;  %v2520_v4 = vld [vmem:[#allocation5] sm:$0xff] }
  0xdb   :  { %1605 = vmatmul.mubr.msk.f32.vlgmr.msra.gmra.mrb[0].mxu0 %vm266_vm0, %v231_v6  ;;  %1610 = vmatmul.mubr.msk.f32.vlgmr.msra.gmra.mrb[0].mxu1 %vm266_vm0, %v231_v6  ;;  %v2511_v60 = vld [vmem:[#allocation5 + $0x8] sm:$0xff]  ;;  %v2522_v5 = vld [vmem:[#allocation5 + $0x30] sm:$0xff]  ;;  %vm532_vm3 = vcmp.lt.s32.totalorder %v2501_v55, 15  ;;  %vm545_vm4 = vcmp.lt.s32.totalorder %v2501_v55, 1  ;;  %vm558_vm5 = vcmp.lt.s32.totalorder %v2501_v55, 127  ;;  %vm571_vm6 = vcmp.lt.s32.totalorder %v2501_v55, 113 }
  0xdc   :  { %352 = vmatprep.mubr.f32.mxu0 %v3033_v0  ;;  %447 = vmatprep.mubr.f32.mxu1 %v3033_v0  ;;  %v2515_v62 = vld [vmem:[#allocation5 + $0x28] sm:$0xff]  ;;  %v2566_v53 = vld [vmem:[#allocation5 + $0x70] sm:$0xff]  ;;  %vm584_vm7 = vcmp.lt.s32.totalorder %v2501_v55, 112  ;;  %vm597_vm8 = vcmp.lt.s32.totalorder %v2501_v55, 111  ;;  %vm1397_vm10 = vcmask 195584   ;;  %s2110_s23 = smov [#allocation22]  }
  0xdd   :  { %248 = vperm.xlu0 %1780, %v237_v7   ;;  %s1587_s5 = sshll.u32 %s2110_s23, 4  ;;  %s1588_s5 = int_to_ptr.vmem [resolvable:$true] %s1587_s5 }
  0xde   :  { %s2046_s0 = scalar_lea.vmem %s1588_s5, 1024  ;;  %p2051_p13 = scmp.lt.s32.totalorder %s1588_s5, %s1588_s5 }
  0xdf   :  { %1606 = vmatmul.mubr.msk.f32.gmra.mrb[2].mxu0 %vm266_vm0, %v232_v8  ;;  %1611 = vmatmul.mubr.msk.f32.gmra.mrb[2].mxu1 %vm266_vm0, %v232_v8  ;;  %v2529_v8 = vld [vmem:[#allocation5 + $0x18] sm:$0xff]  ;;  %p2047_p12 = scmp.ne.s32.totalorder %s1588_s5, %s2046_s0  ;;  %p2052_p0 = scmp.lt.s32.totalorder %s2046_s0, %s2046_s0 }
  0xe0   :  { %358 = vmatprep.mubr.f32.mxu0 %v3033_v0  ;;  %453 = vmatprep.mubr.f32.mxu1 %v3033_v0 }
  0xe1   :  { %253 = vperm.xlu0 %1780, %v238_v9   ;;  %p2053_p1 = por %p2052_p0, %p2051_p13 }
  0xe3   :  { %1607 = vmatmul.mubr.msk.f32.gmra.mrb[4].mxu0 %vm266_vm0, %v233_v10  ;;  %1612 = vmatmul.mubr.msk.f32.gmra.mrb[4].mxu1 %vm266_vm0, %v233_v10  ;;  %p2054_p2 = pnand %p2053_p1, %p2047_p12 }
  0xe4   :  { %364 = vmatprep.mubr.f32.mxu0 %v3033_v0  ;;  %459 = vmatprep.mubr.f32.mxu1 %v3033_v0 }
  0xe7   :  { %1608 = vmatmul.mubr.msk.f32.gmra.mrb[6].mxu0 %vm266_vm0, %v234_v46  ;;  %1613 = vmatmul.mubr.msk.f32.gmra.mrb[6].mxu1 %vm266_vm0, %v234_v46 }
  0xe8   :  { %370 = vmatprep.mubr.f32.mxu0 %v3033_v0  ;;  %465 = vmatprep.mubr.f32.mxu1 %v3033_v0 }
  0xeb   :  { %1609 = vmatmul.mubr.msk.f32.gmra.mrb[8].mxu0 %vm266_vm0, %v235_v49  ;;  %1614 = vmatmul.mubr.msk.f32.gmra.mrb[8].mxu1 %vm266_vm0, %v235_v49 }
  0xec   :  { %713 = vmatprep.mubr.f32.mxu0 %v3033_v0  ;;  %784 = vmatprep.mubr.f32.mxu1 %v3033_v0 }
 0x15c   :  { %v249_v15 = vpop.permute.xlu0 %248 }
 0x160   :  { %v254_v36 = vpop.permute.xlu0 %253 }
 0x1ae   :  { %v2349_v11 = vpop.f32.mrb[0].mxu0  ;;  %v2351_v12 = vpop.f32.mrb[0].mxu1 }
 0x1af   :  { %3035 = vst [vmem:[#allocation31_spill] sm:$0xff] %v2351_v12  ;;  %v2353_v13 = vpop.f32.mrb[1].mxu0  ;;  %v2355_v14 = vpop.f32.mrb[1].mxu1 }
 0x1b0   :  { %3036 = vst [vmem:[#allocation32_spill] sm:$0xff] %v2353_v13  ;;  %3037 = vst [vmem:[#allocation33_spill] sm:$0xff] %v2355_v14 }
 0x1b2   :  { %v354_v16 = vpop.f32.mrb[2].mxu0  ;;  %v449_v17 = vpop.f32.mrb[2].mxu1 }
 0x1b3   :  { %v355_v18 = vadd.f32 %v354_v16, %v249_v15  ;;  %v450_v19 = vadd.f32 %v449_v17, %v249_v15  ;;  %v356_v20 = vpop.f32.mrb[3].mxu0  ;;  %v451_v21 = vpop.f32.mrb[3].mxu1  ;;  %v2537_v16 = vld [vmem:[#allocation5 + $0x38] sm:$0xff]  ;;  %v2539_v17 = vld [vmem:[#allocation5 + $0x10] sm:$0xff] }
 0x1b4   :  { %v357_v22 = vadd.f32 %v356_v20, %v249_v15  ;;  %v452_v30 = vadd.f32 %v451_v21, %v249_v15  ;;  %v2535_v15 = vld [vmem:[#allocation5 + $0x20] sm:$0xff] }
 0x1b5   :  { %v476_v23 = vmax.f32 %v355_v18, 0.0  ;;  %v478_v24 = vmax.f32 %v450_v19, 0.0 }
 0x1b6   :  { %v360_v25 = vpop.f32.mrb[4].mxu0  ;;  %v455_v26 = vpop.f32.mrb[4].mxu1  ;;  %v477_v29 = vmax.f32 %v357_v22, 0.0  ;;  %v479_v34 = vmax.f32 %v452_v30, 0.0 }
 0x1b7   :  { %v2357_v27 = vmin.f32 %v476_v23, 6.0  ;;  %v2359_v28 = vmin.f32 %v478_v24, 6.0  ;;  %v362_v31 = vpop.f32.mrb[5].mxu0  ;;  %v457_v32 = vpop.f32.mrb[5].mxu1  ;;  %v361_v37 = vadd.f32 %v360_v25, %v254_v36  ;;  %v456_v39 = vadd.f32 %v455_v26, %v254_v36 }
 0x1b8   :  { %v2365_v33 = vmin.f32 %v477_v29, 6.0  ;;  %v2371_v35 = vmin.f32 %v479_v34, 6.0  ;;  %v363_v42 = vadd.f32 %v362_v31, %v254_v36  ;;  %v458_v45 = vadd.f32 %v457_v32, %v254_v36 }
 0x1b9   :  { %500 = vrot.lane.b32.xlu0 %v2359_v28, %s2102_s11  ;;  %496 = vrot.lane.b32.xlu1 %v2357_v27, %s2102_s11  ;;  %v480_v38 = vmax.f32 %v361_v37, 0.0  ;;  %v482_v41 = vmax.f32 %v456_v39, 0.0 }
 0x1ba   :  { %v481_v44 = vmax.f32 %v363_v42, 0.0  ;;  %v483_v48 = vmax.f32 %v458_v45, 0.0  ;;  %v2555_v42 = vld [vmem:[#allocation5 + $0x48] sm:$0xff] }
 0x1bb   :  { %v2425_v40 = vmin.f32 %v480_v38, 6.0  ;;  %v2431_v43 = vmin.f32 %v482_v41, 6.0  ;;  %v2559_v45 = vld [vmem:[#allocation5 + $0x68] sm:$0xff] }
 0x1bc   :  { %v2439_v47 = vmin.f32 %v481_v44, 6.0  ;;  %v2449_v50 = vmin.f32 %v483_v48, 6.0 }
 0x1bd   :  { %511 = vrot.lane.b32.xlu0 %v2357_v27, %s2103_s22  ;;  %498 = vrot.lane.b32.xlu1 %v2365_v33, %s2102_s11 }
 0x1c1   :  { %515 = vrot.lane.b32.xlu0 %v2359_v28, %s2103_s22  ;;  %502 = vrot.lane.b32.xlu1 %v2371_v35, %s2102_s11 }
 0x1c5   :  { %524 = vrot.lane.b32.xlu0 %v2357_v27, %s2104_s29  ;;  %513 = vrot.lane.b32.xlu1 %v2365_v33, %s2103_s22 }
 0x1c9   :  { %528 = vrot.lane.b32.xlu0 %v2359_v28, %s2104_s29  ;;  %517 = vrot.lane.b32.xlu1 %v2371_v35, %s2103_s22 }
 0x1cd   :  { %537 = vrot.lane.b32.xlu0 %v2357_v27, %s2105_s6  ;;  %526 = vrot.lane.b32.xlu1 %v2365_v33, %s2104_s29 }
 0x1d1   :  { %541 = vrot.lane.b32.xlu0 %v2359_v28, %s2105_s6  ;;  %530 = vrot.lane.b32.xlu1 %v2371_v35, %s2104_s29 }
 0x1d5   :  { %550 = vrot.lane.b32.xlu0 %v2357_v27, %s2106_s3  ;;  %539 = vrot.lane.b32.xlu1 %v2365_v33, %s2105_s6 }
 0x1d9   :  { %554 = vrot.lane.b32.xlu0 %v2359_v28, %s2106_s3  ;;  %543 = vrot.lane.b32.xlu1 %v2371_v35, %s2105_s6 }
 0x1dd   :  { %563 = vrot.lane.b32.xlu0 %v2357_v27, %s2107_s7  ;;  %552 = vrot.lane.b32.xlu1 %v2365_v33, %s2106_s3 }
 0x1e1   :  { %567 = vrot.lane.b32.xlu0 %v2359_v28, %s2107_s7  ;;  %556 = vrot.lane.b32.xlu1 %v2371_v35, %s2106_s3 }
 0x1e5   :  { %576 = vrot.lane.b32.xlu0 %v2357_v27, %s2108_s28  ;;  %565 = vrot.lane.b32.xlu1 %v2365_v33, %s2107_s7 }
 0x1e9   :  { %580 = vrot.lane.b32.xlu0 %v2359_v28, %s2108_s28  ;;  %569 = vrot.lane.b32.xlu1 %v2371_v35, %s2107_s7 }
 0x1ed   :  { %589 = vrot.lane.b32.xlu0 %v2357_v27, %s2109_s19  ;;  %578 = vrot.lane.b32.xlu1 %v2365_v33, %s2108_s28 }
 0x1f1   :  { %593 = vrot.lane.b32.xlu0 %v2359_v28, %s2109_s19  ;;  %582 = vrot.lane.b32.xlu1 %v2371_v35, %s2108_s28 }
 0x1f5   :  { %799 = vrot.lane.b32.xlu0 %v2425_v40, %s2102_s11  ;;  %591 = vrot.lane.b32.xlu1 %v2365_v33, %s2109_s19 }
 0x1f9   :  { %803 = vrot.lane.b32.xlu0 %v2431_v43, %s2102_s11  ;;  %595 = vrot.lane.b32.xlu1 %v2371_v35, %s2109_s19 }
 0x1fd   :  { %811 = vrot.lane.b32.xlu0 %v2425_v40, %s2103_s22  ;;  %801 = vrot.lane.b32.xlu1 %v2439_v47, %s2102_s11 }
 0x201   :  { %815 = vrot.lane.b32.xlu0 %v2431_v43, %s2103_s22  ;;  %805 = vrot.lane.b32.xlu1 %v2449_v50, %s2102_s11 }
 0x205   :  { %823 = vrot.lane.b32.xlu0 %v2425_v40, %s2104_s29  ;;  %813 = vrot.lane.b32.xlu1 %v2439_v47, %s2103_s22 }
 0x209   :  { %827 = vrot.lane.b32.xlu0 %v2431_v43, %s2104_s29  ;;  %817 = vrot.lane.b32.xlu1 %v2449_v50, %s2103_s22 }
 0x20d   :  { %835 = vrot.lane.b32.xlu0 %v2425_v40, %s2105_s6  ;;  %825 = vrot.lane.b32.xlu1 %v2439_v47, %s2104_s29 }
 0x211   :  { %839 = vrot.lane.b32.xlu0 %v2431_v43, %s2105_s6  ;;  %829 = vrot.lane.b32.xlu1 %v2449_v50, %s2104_s29 }
 0x215   :  { %847 = vrot.lane.b32.xlu0 %v2425_v40, %s2106_s3  ;;  %837 = vrot.lane.b32.xlu1 %v2439_v47, %s2105_s6 }
 0x219   :  { %851 = vrot.lane.b32.xlu0 %v2431_v43, %s2106_s3  ;;  %841 = vrot.lane.b32.xlu1 %v2449_v50, %s2105_s6 }
 0x21d   :  { %859 = vrot.lane.b32.xlu0 %v2425_v40, %s2107_s7  ;;  %849 = vrot.lane.b32.xlu1 %v2439_v47, %s2106_s3 }
 0x221   :  { %863 = vrot.lane.b32.xlu0 %v2431_v43, %s2107_s7  ;;  %853 = vrot.lane.b32.xlu1 %v2449_v50, %s2106_s3 }
 0x225   :  { %871 = vrot.lane.b32.xlu0 %v2425_v40, %s2108_s28  ;;  %861 = vrot.lane.b32.xlu1 %v2439_v47, %s2107_s7 }
 0x229   :  { %875 = vrot.lane.b32.xlu0 %v2431_v43, %s2108_s28  ;;  %865 = vrot.lane.b32.xlu1 %v2449_v50, %s2107_s7 }
 0x22b   :  { %v501_v51 = vpop.permute.xlu0 %500  ;;  %v497_v52 = vpop.permute.xlu1 %496 }
 0x22d   :  { %883 = vrot.lane.b32.xlu0 %v2425_v40, %s2109_s19  ;;  %873 = vrot.lane.b32.xlu1 %v2439_v47, %s2108_s28 }
 0x22f   :  { %v512_v54 = vpop.permute.xlu0 %511  ;;  %v499_v56 = vpop.permute.xlu1 %498 }
 0x230   :  { %v509_v61 = vsel %vm506_vm1, %v497_v52, %v499_v56  ;;  %v508_v18 = vsel %vm506_vm1, %v499_v56, %v501_v51 }
 0x231   :  { %887 = vrot.lane.b32.xlu0 %v2431_v43, %s2109_s19  ;;  %877 = vrot.lane.b32.xlu1 %v2449_v50, %s2108_s28  ;;  %v603_v3 = vmul.f32 %v509_v61, %v2511_v60  ;;  %v604_v31 = vmul.f32 %v508_v18, %v2539_v17  ;;  %v2577_v61 = vld [vmem:[#allocation5 + $0x60] sm:$0xff] }
 0x233   :  { %v516_v58 = vpop.permute.xlu0 %515  ;;  %v503_v59 = vpop.permute.xlu1 %502 }
 0x234   :  { %v507_v9 = vsel %vm506_vm1, %v501_v51, %v503_v59  ;;  %v510_v10 = vsel %vm506_vm1, %v503_v59, %v497_v52  ;;  %v2564_v52 = vld [vmem:[#allocation5 + $0x40] sm:$0xff] }
 0x235   :  { %935 = vperm.xlu0 %1780, %v932_v57   ;;  %885 = vrot.lane.b32.xlu1 %v2439_v47, %s2109_s19  ;;  %v602_v25 = vmul.f32 %v510_v10, %v2520_v4  ;;  %v605_v26 = vmul.f32 %v507_v9, %v2529_v8  ;;  %v2571_v57 = vld [vmem:[#allocation5 + $0x58] sm:$0xff] }
 0x237   :  { %v525_v63 = vpop.permute.xlu0 %524  ;;  %v514_v1 = vpop.permute.xlu1 %513 }
 0x238   :  { %v522_v2 = vsel %vm519_vm2, %v512_v54, %v514_v1  ;;  %v521_v6 = vsel %vm519_vm2, %v514_v1, %v516_v58  ;;  %v2579_v1 = vld [vmem:[#allocation5 + $0x78] sm:$0xff] }
 0x239   :  { %v607_v7 = vmul.f32 %v522_v2, %v2515_v62  ;;  %889 = vrot.lane.b32.xlu1 %v2449_v50, %s2109_s19  ;;  %v608_v22 = vmul.f32 %v521_v6, %v2522_v5  ;;  %v2581_v2 = vld [vmem:[#allocation5 + $0x50] sm:$0xff] }
 0x23b   :  { %v529_v19 = vpop.permute.xlu0 %528  ;;  %v518_v20 = vpop.permute.xlu1 %517  ;;  %v1625_v21 = vpack.c.bf16 %v607_v7, %v603_v3  ;;  %v1643_v38 = vpack.c.bf16 %v608_v22, %v604_v31 }
 0x23c   :  { %v520_v23 = vsel %vm519_vm2, %v516_v58, %v518_v20  ;;  %v523_v24 = vsel %vm519_vm2, %v518_v20, %v512_v54 }
 0x23d   :  { %v606_v29 = vmul.f32 %v523_v24, %v2535_v15  ;;  %v609_v30 = vmul.f32 %v520_v23, %v2537_v16  ;;  %1626 = vmatprep.subr.bf16.mxu0 %v1625_v21  ;;  %v2595_v23 = vld [vmem:[#allocation5 + $0x80] sm:$0xff] }
 0x23f   :  { %v1627_v32 = vpack.c.bf16 %v606_v29, %v602_v25  ;;  %v538_v34 = vpop.permute.xlu0 %537  ;;  %v527_v36 = vpop.permute.xlu1 %526  ;;  %v1641_v37 = vpack.c.bf16 %v609_v30, %v605_v26  ;;  %v2598_v25 = vld [vmem:[#allocation5 + $0xa0] sm:$0xff]  ;;  %v2600_v26 = vld [vmem:[#allocation5 + $0xa8] sm:$0xff] }
 0x240   :  { %v535_v44 = vsel %vm532_vm3, %v525_v63, %v527_v36  ;;  %v534_v3 = vsel %vm532_vm3, %v527_v36, %v529_v19  ;;  %v2602_v29 = vld [vmem:[#allocation5 + $0x88] sm:$0xff] }
 0x241   :  { %1628 = vmatpush1.bf16.msra.mxu0 %v1627_v32  ;;  %1642 = vmatprep.subr.bf16.mxu1 %v1641_v37  ;;  %v611_v51 = vmul.f32 %v535_v44, %v2555_v42  ;;  %v612_v24 = vmul.f32 %v534_v3, %v2581_v2 }
 0x242   :  { %1644 = vmatpush1.bf16.msra.mxu1 %v1643_v38 }
 0x243   :  { %v542_v39 = vpop.permute.xlu0 %541  ;;  %v531_v41 = vpop.permute.xlu1 %530 }
 0x244   :  { %v533_v58 = vsel %vm532_vm3, %v529_v19, %v531_v41  ;;  %v536_v59 = vsel %vm532_vm3, %v531_v41, %v525_v63 }
 0x245   :  { %v610_v20 = vmul.f32 %v536_v59, %v2564_v52  ;;  %v613_v21 = vmul.f32 %v533_v58, %v2571_v57 }
 0x247   :  { %v551_v46 = vpop.permute.xlu0 %550  ;;  %v540_v48 = vpop.permute.xlu1 %539 }
 0x248   :  { %v548_v49 = vsel %vm545_vm4, %v538_v34, %v540_v48  ;;  %v547_v54 = vsel %vm545_vm4, %v540_v48, %v542_v39  ;;  %v2612_v48 = vld [vmem:[#allocation5 + $0x90] sm:$0xff] }
 0x249   :  { %v615_v56 = vmul.f32 %v548_v49, %v2559_v45  ;;  %v616_v10 = vmul.f32 %v547_v54, %v2566_v53  ;;  %v619_v49 = vmul.f32 %v2365_v33, %v2602_v29  ;;  %v2618_v54 = vld [vmem:[#allocation5 + $0xb8] sm:$0xff]  ;;  %v620_v33 = vmul.f32 %v2359_v28, %v2612_v48  ;;  %v2633_v28 = vld [vmem:[#allocation5 + $0xc0] sm:$0xff] }
 0x24b   :  { %v555_v6 = vpop.permute.xlu0 %554  ;;  %v544_v7 = vpop.permute.xlu1 %543  ;;  %v1629_v9 = vpack.c.bf16 %v615_v56, %v611_v51  ;;  %v1647_v36 = vpack.c.bf16 %v616_v10, %v612_v24  ;;  %v2616_v51 = vld [vmem:[#allocation5 + $0xb0] sm:$0xff]  ;;  %v2620_v56 = vld [vmem:[#allocation5 + $0x98] sm:$0xff]  ;;  %v2636_v24 = vld [vmem:[#allocation5 + $0xc8] sm:$0xff] }
 0x24c   :  { %v546_v18 = vsel %vm545_vm4, %v542_v39, %v544_v7  ;;  %v549_v63 = vsel %vm545_vm4, %v544_v7, %v538_v34  ;;  %v618_v39 = vmul.f32 %v2357_v27, %v2595_v23 }
 0x24d   :  { %v614_v22 = vmul.f32 %v549_v63, %v2577_v61  ;;  %v617_v19 = vmul.f32 %v546_v18, %v2579_v1  ;;  %1630 = vmatprep.subr.bf16.mxu0 %v1629_v9  ;;  %v621_v63 = vmul.f32 %v2371_v35, %v2620_v56 }
 0x24f   :  { %v1631_v30 = vpack.c.bf16 %v614_v22, %v610_v20  ;;  %v564_v31 = vpop.permute.xlu0 %563  ;;  %v553_v32 = vpop.permute.xlu1 %552  ;;  %v1645_v34 = vpack.c.bf16 %v617_v19, %v613_v21 }
 0x250   :  { %v560_v37 = vsel %vm558_vm5, %v553_v32, %v555_v6  ;;  %v561_v38 = vsel %vm558_vm5, %v551_v46, %v553_v32  ;;  %v2642_v32 = vld [vmem:[#allocation5 + $0xe0] sm:$0xff] }
 0x251   :  { %v622_v41 = vmul.f32 %v561_v38, %v2598_v25  ;;  %v623_v44 = vmul.f32 %v560_v37, %v2600_v26  ;;  %1632 = vmatpush1.bf16.msra.mxu0 %v1631_v30  ;;  %1646 = vmatprep.subr.bf16.mxu1 %v1645_v34  ;;  %v2644_v34 = vld [vmem:[#allocation5 + $0xe8] sm:$0xff] }
 0x252   :  { %1648 = vmatpush1.bf16.msra.mxu1 %v1647_v36 }
 0x253   :  { %v1635_v58 = vpack.c.bf16 %v622_v41, %v618_v39  ;;  %v568_v27 = vpop.permute.xlu0 %567  ;;  %v557_v59 = vpop.permute.xlu1 %556  ;;  %v1633_v3 = vpack.c.bf16 %v623_v44, %v619_v49  ;;  %v2652_v49 = vld [vmem:[#allocation5 + $0xd0] sm:$0xff] }
 0x254   :  { %v559_v7 = vsel %vm558_vm5, %v555_v6, %v557_v59  ;;  %v562_v9 = vsel %vm558_vm5, %v557_v59, %v551_v46 }
 0x255   :  { %v624_v10 = vmul.f32 %v559_v7, %v2616_v51  ;;  %v625_v18 = vmul.f32 %v562_v9, %v2618_v54  ;;  %1634 = vmatprep.subr.bf16.mxu0 %v1633_v3  ;;  %v2656_v3 = vld [vmem:[#allocation5 + $0xd8] sm:$0xff] }
 0x256   :  { %1636 = vmatpush1.bf16.msra.mxu0 %v1635_v58 }
 0x257   :  { %v1651_v20 = vpack.c.bf16 %v624_v10, %v620_v33  ;;  %v577_v21 = vpop.permute.xlu0 %576  ;;  %v566_v22 = vpop.permute.xlu1 %565  ;;  %v1649_v19 = vpack.c.bf16 %v625_v18, %v621_v63  ;;  %v2662_v33 = vld [vmem:[#allocation5 + $0xf0] sm:$0xff]  ;;  %v2664_v10 = vld [vmem:[#allocation5 + $0xf8] sm:$0xff] }
 0x258   :  { %v573_v35 = vsel %vm571_vm6, %v566_v22, %v568_v27  ;;  %v574_v30 = vsel %vm571_vm6, %v564_v31, %v566_v22 }
 0x259   :  { %1650 = vmatprep.subr.bf16.mxu1 %v1649_v19  ;;  %v626_v41 = vmul.f32 %v574_v30, %v2633_v28  ;;  %v627_v44 = vmul.f32 %v573_v35, %v2636_v24 }
 0x25a   :  { %1652 = vmatpush1.bf16.msra.mxu1 %v1651_v20 }
 0x25b   :  { %v581_v46 = vpop.permute.xlu0 %580  ;;  %v570_v6 = vpop.permute.xlu1 %569 }
 0x25c   :  { %v572_v7 = vsel %vm571_vm6, %v568_v27, %v570_v6  ;;  %v575_v9 = vsel %vm571_vm6, %v570_v6, %v564_v31 }
 0x25d   :  { %v628_v27 = vmul.f32 %v572_v7, %v2652_v49  ;;  %v629_v31 = vmul.f32 %v575_v9, %v2656_v3  ;;  %v2685_v9 = vld [vmem:[#allocation5 + $0x110] sm:$0xff] }
 0x25f   :  { %v590_v36 = vpop.permute.xlu0 %589  ;;  %v579_v37 = vpop.permute.xlu1 %578 }
 0x260   :  { %v586_v38 = vsel %vm584_vm7, %v579_v37, %v581_v46  ;;  %v587_v39 = vsel %vm584_vm7, %v577_v21, %v579_v37  ;;  %v2675_v37 = vld [vmem:[#allocation5 + $0x100] sm:$0xff] }
 0x261   :  { %v630_v58 = vmul.f32 %v587_v39, %v2642_v32  ;;  %v631_v59 = vmul.f32 %v586_v38, %v2644_v34  ;;  %v2677_v38 = vld [vmem:[#allocation5 + $0x108] sm:$0xff] }
 0x263   :  { %v1639_v18 = vpack.c.bf16 %v630_v58, %v626_v41  ;;  %v594_v63 = vpop.permute.xlu0 %593  ;;  %v583_v20 = vpop.permute.xlu1 %582  ;;  %v1637_v22 = vpack.c.bf16 %v631_v59, %v627_v44 }
 0x264   :  { %v585_v19 = vsel %vm584_vm7, %v581_v46, %v583_v20  ;;  %v588_v35 = vsel %vm584_vm7, %v583_v20, %v577_v21  ;;  %v638_v20 = vld [vmem:[#allocation10] sm:$0xff] }
 0x265   :  { %v632_v6 = vmul.f32 %v585_v19, %v2662_v33  ;;  %v633_v30 = vmul.f32 %v588_v35, %v2664_v10  ;;  %1638 = vmatprep.subr.bf16.mxu0 %v1637_v22 }
 0x266   :  { %1640 = vmatpush1.bf16.msra.mxu0 %v1639_v18  ;;  %v2687_v18 = vld [vmem:[#allocation5 + $0x118] sm:$0xff] }
 0x267   :  { %v1655_v46 = vpack.c.bf16 %v632_v6, %v628_v27  ;;  %v800_v39 = vpop.permute.xlu0 %799  ;;  %v592_v41 = vpop.permute.xlu1 %591  ;;  %v1653_v21 = vpack.c.bf16 %v633_v30, %v629_v31 }
 0x268   :  { %v599_v44 = vsel %vm597_vm8, %v592_v41, %v594_v63  ;;  %v600_v58 = vsel %vm597_vm8, %v590_v36, %v592_v41 }
 0x269   :  { %v634_v59 = vmul.f32 %v600_v58, %v2675_v37  ;;  %v635_v7 = vmul.f32 %v599_v44, %v2677_v38  ;;  %1654 = vmatprep.subr.bf16.mxu1 %v1653_v21 }
 0x26a   :  { %1656 = vmatpush1.bf16.msra.mxu1 %v1655_v46 }
 0x26b   :  { %v804_v22 = vpop.permute.xlu0 %803  ;;  %v596_v19 = vpop.permute.xlu1 %595  ;;  %665 = vmatprep.subr.mxu0 %v635_v7 }
 0x26c   :  { %v598_v35 = vsel %vm597_vm8, %v594_v63, %v596_v19  ;;  %v601_v27 = vsel %vm597_vm8, %v596_v19, %v590_v36  ;;  %666 = vmatpush1.msra.mxu0 %v634_v59 }
 0x26d   :  { %v636_v31 = vmul.f32 %v598_v35, %v2685_v9  ;;  %v637_v6 = vmul.f32 %v601_v27, %v2687_v18  ;;  %1615 = vmatmul.mubr.msk.f32.vlgmr.msra.gmra.mrb[10].mxu0 %vm645_vm9, %v638_v20 }
 0x26e   :  { %1005 = vmatprep.mubr.f32.mxu0 %v3033_v0 }
 0x26f   :  { %v812_v30 = vpop.permute.xlu0 %811  ;;  %736 = vmatprep.subr.mxu1 %v637_v6  ;;  %v802_v46 = vpop.permute.xlu1 %801 }
 0x270   :  { %737 = vmatpush1.msra.mxu1 %v636_v31  ;;  %v809_v36 = vsel %vm506_vm1, %v800_v39, %v802_v46  ;;  %v808_v27 = vsel %vm506_vm1, %v802_v46, %v804_v22 }
 0x271   :  { %1616 = vmatmul.mubr.msk.f32.vlgmr.msra.gmra.mrb[10].mxu1 %vm645_vm9, %v638_v20  ;;  %v896_v59 = vmul.f32 %v809_v36, %v2511_v60 }
 0x272   :  { %1076 = vmatprep.mubr.f32.mxu1 %v3033_v0 }
 0x273   :  { %v816_v63 = vpop.permute.xlu0 %815  ;;  %v806_v41 = vpop.permute.xlu1 %805 }
 0x274   :  { %v807_v20 = vsel %vm506_vm1, %v804_v22, %v806_v41  ;;  %v810_v35 = vsel %vm506_vm1, %v806_v41, %v800_v39  ;;  %v897_v22 = vmul.f32 %v808_v27, %v2539_v17 }
 0x275   :  { %v898_v12 = vmul.f32 %v807_v20, %v2529_v8 }
 0x277   :  { %v824_v21 = vpop.permute.xlu0 %823  ;;  %v814_v44 = vpop.permute.xlu1 %813 }
 0x278   :  { %v821_v58 = vsel %vm519_vm2, %v812_v30, %v814_v44  ;;  %v820_v7 = vsel %vm519_vm2, %v814_v44, %v816_v63 }
 0x279   :  { %v900_v19 = vmul.f32 %v821_v58, %v2515_v62  ;;  %v901_v14 = vmul.f32 %v820_v7, %v2522_v5  ;;  %v895_v58 = vmul.f32 %v810_v35, %v2520_v4 }
 0x27b   :  { %v828_v31 = vpop.permute.xlu0 %827  ;;  %v818_v6 = vpop.permute.xlu1 %817  ;;  %v1657_v0 = vpack.c.bf16 %v900_v19, %v896_v59  ;;  %v1675_v13 = vpack.c.bf16 %v901_v14, %v897_v22 }
 0x27c   :  { %v819_v36 = vsel %vm519_vm2, %v816_v63, %v818_v6  ;;  %v822_v44 = vsel %vm519_vm2, %v818_v6, %v812_v30 }
 0x27d   :  { %v899_v39 = vmul.f32 %v822_v44, %v2535_v15  ;;  %v902_v41 = vmul.f32 %v819_v36, %v2537_v16  ;;  %1658 = vmatprep.subr.bf16.mxu0 %v1657_v0 }
 0x27f   :  { %v1659_v46 = vpack.c.bf16 %v899_v39, %v895_v58  ;;  %v836_v59 = vpop.permute.xlu0 %835  ;;  %v826_v7 = vpop.permute.xlu1 %825  ;;  %v1673_v19 = vpack.c.bf16 %v902_v41, %v898_v12 }
 0x280   :  { %v833_v20 = vsel %vm532_vm3, %v824_v21, %v826_v7  ;;  %v832_v44 = vsel %vm532_vm3, %v826_v7, %v828_v31 }
 0x281   :  { %1660 = vmatpush1.bf16.msra.mxu0 %v1659_v46  ;;  %1674 = vmatprep.subr.bf16.mxu1 %v1673_v19  ;;  %v904_v27 = vmul.f32 %v833_v20, %v2555_v42 }
 0x282   :  { %1676 = vmatpush1.bf16.msra.mxu1 %v1675_v13 }
 0x283   :  { %v840_v30 = vpop.permute.xlu0 %839  ;;  %v830_v63 = vpop.permute.xlu1 %829 }
 0x284   :  { %v831_v13 = vsel %vm532_vm3, %v828_v31, %v830_v63  ;;  %v834_v14 = vsel %vm532_vm3, %v830_v63, %v824_v21  ;;  %v905_v31 = vmul.f32 %v832_v44, %v2581_v2  ;;  %v912_v44 = vmul.f32 %v2439_v47, %v2602_v29 }
 0x285   :  { %v903_v20 = vmul.f32 %v834_v14, %v2564_v52  ;;  %v914_v47 = vmul.f32 %v2449_v50, %v2620_v56 }
 0x287   :  { %v848_v35 = vpop.permute.xlu0 %847  ;;  %v838_v6 = vpop.permute.xlu1 %837 }
 0x288   :  { %v845_v0 = vsel %vm545_vm4, %v836_v59, %v838_v6  ;;  %v844_v36 = vsel %vm545_vm4, %v838_v6, %v840_v30  ;;  %v906_v6 = vmul.f32 %v831_v13, %v2571_v57 }
 0x289   :  { %v908_v12 = vmul.f32 %v845_v0, %v2559_v45  ;;  %v909_v22 = vmul.f32 %v844_v36, %v2566_v53 }
 0x28b   :  { %v852_v58 = vpop.permute.xlu0 %851  ;;  %v842_v39 = vpop.permute.xlu1 %841  ;;  %v1661_v41 = vpack.c.bf16 %v908_v12, %v904_v27  ;;  %v1679_v12 = vpack.c.bf16 %v909_v22, %v905_v31 }
 0x28c   :  { %v843_v46 = vsel %vm545_vm4, %v840_v30, %v842_v39  ;;  %v846_v19 = vsel %vm545_vm4, %v842_v39, %v836_v59  ;;  %v911_v30 = vmul.f32 %v2425_v40, %v2595_v23 }
 0x28d   :  { %v907_v21 = vmul.f32 %v846_v19, %v2577_v61  ;;  %v910_v63 = vmul.f32 %v843_v46, %v2579_v1  ;;  %1662 = vmatprep.subr.bf16.mxu0 %v1661_v41 }
 0x28f   :  { %v1663_v7 = vpack.c.bf16 %v907_v21, %v903_v20  ;;  %v860_v0 = vpop.permute.xlu0 %859  ;;  %v850_v27 = vpop.permute.xlu1 %849  ;;  %v1677_v36 = vpack.c.bf16 %v910_v63, %v906_v6  ;;  %v913_v6 = vmul.f32 %v2431_v43, %v2612_v48 }
 0x290   :  { %v856_v59 = vsel %vm558_vm5, %v850_v27, %v852_v58  ;;  %v857_v13 = vsel %vm558_vm5, %v848_v35, %v850_v27 }
 0x291   :  { %v915_v14 = vmul.f32 %v857_v13, %v2598_v25  ;;  %v916_v39 = vmul.f32 %v856_v59, %v2600_v26  ;;  %1664 = vmatpush1.bf16.msra.mxu0 %v1663_v7  ;;  %1678 = vmatprep.subr.bf16.mxu1 %v1677_v36 }
 0x292   :  { %1680 = vmatpush1.bf16.msra.mxu1 %v1679_v12 }
 0x293   :  { %v1667_v41 = vpack.c.bf16 %v915_v14, %v911_v30  ;;  %v864_v22 = vpop.permute.xlu0 %863  ;;  %v854_v46 = vpop.permute.xlu1 %853  ;;  %v1665_v40 = vpack.c.bf16 %v916_v39, %v912_v44 }
 0x294   :  { %v855_v19 = vsel %vm558_vm5, %v852_v58, %v854_v46  ;;  %v858_v20 = vsel %vm558_vm5, %v854_v46, %v848_v35 }
 0x295   :  { %v917_v21 = vmul.f32 %v855_v19, %v2616_v51  ;;  %v918_v63 = vmul.f32 %v858_v20, %v2618_v54  ;;  %1666 = vmatprep.subr.bf16.mxu0 %v1665_v40 }
 0x296   :  { %1668 = vmatpush1.bf16.msra.mxu0 %v1667_v41 }
 0x297   :  { %v1683_v31 = vpack.c.bf16 %v917_v21, %v913_v6  ;;  %v872_v7 = vpop.permute.xlu0 %871  ;;  %v862_v27 = vpop.permute.xlu1 %861  ;;  %v1681_v36 = vpack.c.bf16 %v918_v63, %v914_v47 }
 0x298   :  { %v868_v43 = vsel %vm571_vm6, %v862_v27, %v864_v22  ;;  %v869_v12 = vsel %vm571_vm6, %v860_v0, %v862_v27 }
 0x299   :  { %1682 = vmatprep.subr.bf16.mxu1 %v1681_v36  ;;  %v919_v13 = vmul.f32 %v869_v12, %v2633_v28  ;;  %v920_v14 = vmul.f32 %v868_v43, %v2636_v24 }
 0x29a   :  { %1684 = vmatpush1.bf16.msra.mxu1 %v1683_v31 }
 0x29b   :  { %v876_v58 = vpop.permute.xlu0 %875  ;;  %v866_v35 = vpop.permute.xlu1 %865 }
 0x29c   :  { %v867_v46 = vsel %vm571_vm6, %v864_v22, %v866_v35  ;;  %v870_v40 = vsel %vm571_vm6, %v866_v35, %v860_v0 }
 0x29d   :  { %v921_v47 = vmul.f32 %v867_v46, %v2652_v49  ;;  %v922_v31 = vmul.f32 %v870_v40, %v2656_v3  ;;  %v3038_v46 = vmov 0.0  }
 0x29f   :  { %v874_v30 = vpop.permute.xlu1 %873  ;;  %v884_v39 = vpop.permute.xlu0 %883 }
 0x2a0   :  { %v880_v59 = vsel %vm584_vm7, %v874_v30, %v876_v58  ;;  %v881_v50 = vsel %vm584_vm7, %v872_v7, %v874_v30 }
 0x2a1   :  { %v923_v44 = vmul.f32 %v881_v50, %v2642_v32  ;;  %v924_v41 = vmul.f32 %v880_v59, %v2644_v34  ;;  %v931_v59 = vld [vmem:[#allocation13] sm:$0xff] }
 0x2a3   :  { %v1671_v19 = vpack.c.bf16 %v923_v44, %v919_v13  ;;  %v878_v20 = vpop.permute.xlu1 %877  ;;  %v1669_v6 = vpack.c.bf16 %v924_v41, %v920_v14  ;;  %v888_v0 = vpop.permute.xlu0 %887 }
 0x2a4   :  { %v879_v21 = vsel %vm584_vm7, %v876_v58, %v878_v20  ;;  %v882_v63 = vsel %vm584_vm7, %v878_v20, %v872_v7 }
 0x2a5   :  { %v925_v27 = vmul.f32 %v879_v21, %v2662_v33  ;;  %v926_v22 = vmul.f32 %v882_v63, %v2664_v10  ;;  %1670 = vmatprep.subr.bf16.mxu0 %v1669_v6 }
 0x2a6   :  { %1672 = vmatpush1.bf16.msra.mxu0 %v1671_v19 }
 0x2a7   :  { %v1687_v36 = vpack.c.bf16 %v925_v27, %v921_v47  ;;  %v886_v35 = vpop.permute.xlu1 %885  ;;  %v1685_v43 = vpack.c.bf16 %v926_v22, %v922_v31 }
 0x2a8   :  { %v892_v58 = vsel %vm597_vm8, %v886_v35, %v888_v0  ;;  %v893_v7 = vsel %vm597_vm8, %v884_v39, %v886_v35 }
 0x2a9   :  { %v927_v12 = vmul.f32 %v893_v7, %v2675_v37  ;;  %v928_v30 = vmul.f32 %v892_v58, %v2677_v38  ;;  %1686 = vmatprep.subr.bf16.mxu1 %v1685_v43 }
 0x2aa   :  { %1688 = vmatpush1.bf16.msra.mxu1 %v1687_v36 }
 0x2ab   :  { %v890_v50 = vpop.permute.xlu1 %889  ;;  %957 = vmatprep.subr.mxu0 %v928_v30 }
 0x2ac   :  { %v891_v13 = vsel %vm597_vm8, %v888_v0, %v890_v50  ;;  %v894_v14 = vsel %vm597_vm8, %v890_v50, %v884_v39  ;;  %958 = vmatpush1.msra.mxu0 %v927_v12 }
 0x2ad   :  { %v929_v44 = vmul.f32 %v891_v13, %v2685_v9  ;;  %v930_v41 = vmul.f32 %v894_v14, %v2687_v18  ;;  %1617 = vmatmul.mubr.msk.f32.vlgmr.msra.gmra.mrb[12].mxu0 %vm645_vm9, %v931_v59  ;;  %v236_v13 = vld [vmem:[#allocation8] sm:$0xff]  ;;  %v639_v14 = vld [vmem:[#allocation11] sm:$0xff] }
 0x2ae   :  { %1297 = vmatprep.mubr.f32.mxu0 %v3038_v46 }
 0x2af   :  { %1028 = vmatprep.subr.mxu1 %v930_v41  ;;  %v1385_v41 = vld [vmem:[#allocation20] sm:$0xff] }
 0x2b0   :  { %1029 = vmatpush1.msra.mxu1 %v929_v44  ;;  %v239_v44 = vld [vmem:[#allocation8 + $0x18] sm:$0xff] }
 0x2b1   :  { %1618 = vmatmul.mubr.msk.f32.vlgmr.msra.gmra.mrb[12].mxu1 %vm645_vm9, %v931_v59 }
 0x2b2   :  { %1368 = vmatprep.mubr.f32.mxu1 %v3038_v46 }
 0x2b4   :  { %v936_v6 = vpop.permute.xlu0 %935 }
 0x340   :  { %v2807_v40 = vpop.f32.mrb[10].mxu0 }
 0x341   :  { %v2809_v19 = vpop.f32.mrb[11].mxu0 }
 0x344   :  { %v2811_v39 = vpop.f32.mrb[10].mxu1 }
 0x345   :  { %v2813_v20 = vpop.f32.mrb[11].mxu1 }
 0x346   :  { %3039 = vst [vmem:[#allocation34_spill] sm:$0xff] %v2813_v20 }
 0x380   :  { %v1007_v21 = vpop.f32.mrb[12].mxu0 }
 0x381   :  { %v1008_v63 = vadd.f32 %v1007_v21, %v936_v6  ;;  %v1009_v47 = vpop.f32.mrb[13].mxu0  ;;  %v240_v21 = vld [vmem:[#allocation8 + $0x20] sm:$0xff] }
 0x382   :  { %v1010_v31 = vadd.f32 %v1009_v47, %v936_v6 }
 0x383   :  { %v1083_v27 = vmax.f32 %v1008_v63, 0.0  ;;  %v1386_v63 = vld [vmem:[#allocation20 + $0x8] sm:$0xff] }
 0x384   :  { %v1084_v22 = vmax.f32 %v1010_v31, 0.0  ;;  %v1078_v0 = vpop.f32.mrb[12].mxu1 }
 0x385   :  { %v2815_v36 = vmin.f32 %v1083_v27, 6.0  ;;  %v1079_v35 = vadd.f32 %v1078_v0, %v936_v6  ;;  %v1080_v43 = vpop.f32.mrb[13].mxu1 }
 0x386   :  { %v2817_v58 = vmin.f32 %v1084_v22, 6.0  ;;  %v1081_v7 = vadd.f32 %v1080_v43, %v936_v6  ;;  %v1224_v6 = vld [vmem:[#allocation17] sm:$0xff] }
 0x387   :  { %v1085_v12 = vmax.f32 %v1079_v35, 0.0  ;;  %1091 = vrot.lane.b32.xlu1 %v2815_v36, %s2102_s11 }
 0x388   :  { %v1086_v30 = vmax.f32 %v1081_v7, 0.0  ;;  %1093 = vrot.lane.b32.xlu0 %v2817_v58, %s2102_s11 }
 0x389   :  { %v2823_v59 = vmin.f32 %v1085_v12, 6.0 }
 0x38a   :  { %v2825_v50 = vmin.f32 %v1086_v30, 6.0 }
 0x38b   :  { %1095 = vrot.lane.b32.xlu1 %v2823_v59, %s2102_s11 }
 0x38c   :  { %1097 = vrot.lane.b32.xlu0 %v2825_v50, %s2102_s11 }
 0x38f   :  { %1103 = vrot.lane.b32.xlu1 %v2815_v36, %s2103_s22 }
 0x390   :  { %1105 = vrot.lane.b32.xlu0 %v2817_v58, %s2103_s22 }
 0x393   :  { %1107 = vrot.lane.b32.xlu1 %v2823_v59, %s2103_s22 }
 0x394   :  { %1109 = vrot.lane.b32.xlu0 %v2825_v50, %s2103_s22 }
 0x397   :  { %1115 = vrot.lane.b32.xlu1 %v2815_v36, %s2104_s29 }
 0x398   :  { %1117 = vrot.lane.b32.xlu0 %v2817_v58, %s2104_s29 }
 0x39b   :  { %1119 = vrot.lane.b32.xlu1 %v2823_v59, %s2104_s29 }
 0x39c   :  { %1121 = vrot.lane.b32.xlu0 %v2825_v50, %s2104_s29 }
 0x39f   :  { %1127 = vrot.lane.b32.xlu1 %v2815_v36, %s2105_s6 }
 0x3a0   :  { %1129 = vrot.lane.b32.xlu0 %v2817_v58, %s2105_s6 }
 0x3a3   :  { %1131 = vrot.lane.b32.xlu1 %v2823_v59, %s2105_s6 }
 0x3a4   :  { %1133 = vrot.lane.b32.xlu0 %v2825_v50, %s2105_s6 }
 0x3a7   :  { %1139 = vrot.lane.b32.xlu1 %v2815_v36, %s2106_s3 }
 0x3a8   :  { %1141 = vrot.lane.b32.xlu0 %v2817_v58, %s2106_s3 }
 0x3ab   :  { %1143 = vrot.lane.b32.xlu1 %v2823_v59, %s2106_s3 }
 0x3ac   :  { %1145 = vrot.lane.b32.xlu0 %v2825_v50, %s2106_s3 }
 0x3af   :  { %1151 = vrot.lane.b32.xlu1 %v2815_v36, %s2107_s7 }
 0x3b0   :  { %1153 = vrot.lane.b32.xlu0 %v2817_v58, %s2107_s7 }
 0x3b3   :  { %1155 = vrot.lane.b32.xlu1 %v2823_v59, %s2107_s7 }
 0x3b4   :  { %1157 = vrot.lane.b32.xlu0 %v2825_v50, %s2107_s7 }
 0x3b7   :  { %1163 = vrot.lane.b32.xlu1 %v2815_v36, %s2108_s28 }
 0x3b8   :  { %1165 = vrot.lane.b32.xlu0 %v2817_v58, %s2108_s28 }
 0x3bb   :  { %1167 = vrot.lane.b32.xlu1 %v2823_v59, %s2108_s28 }
 0x3bc   :  { %1169 = vrot.lane.b32.xlu0 %v2825_v50, %s2108_s28 }
 0x3bf   :  { %1175 = vrot.lane.b32.xlu1 %v2815_v36, %s2109_s19 }
 0x3c0   :  { %1177 = vrot.lane.b32.xlu0 %v2817_v58, %s2109_s19 }
 0x3c3   :  { %1179 = vrot.lane.b32.xlu1 %v2823_v59, %s2109_s19 }
 0x3c4   :  { %1181 = vrot.lane.b32.xlu0 %v2825_v50, %s2109_s19 }
 0x3c7   :  { %243 = vperm.xlu1 %1781, %v236_v13  }
 0x3c8   :  { %642 = vperm.xlu0 %1780, %v639_v14  }
 0x3cb   :  { %1227 = vperm.xlu1 %1781, %v1224_v6  }
 0x3cc   :  { %258 = vperm.xlu0 %1780, %v239_v44  }
 0x3cf   :  { %263 = vperm.xlu1 %1781, %v240_v21  }
 0x3d0   :  { %1389 = vperm.xlu0 %1780, %v1385_v41  }
 0x3d3   :  { %1394 = vperm.xlu1 %1781, %v1386_v63  }
 0x3f9   :  { %v1092_v47 = vpop.permute.xlu1 %1091 }
 0x3fa   :  { %v1094_v31 = vpop.permute.xlu0 %1093 }
 0x3fb   :  { %v1101_v0 = vsel %vm506_vm1, %v1092_v47, %v1094_v31 }
 0x3fc   :  { %v1188_v12 = vmul.f32 %v1101_v0, %v2511_v60 }
 0x3fd   :  { %v1096_v27 = vpop.permute.xlu1 %1095 }
 0x3fe   :  { %v1098_v22 = vpop.permute.xlu0 %1097  ;;  %v1100_v41 = vsel %vm506_vm1, %v1094_v31, %v1096_v27 }
 0x3ff   :  { %v1099_v13 = vsel %vm506_vm1, %v1096_v27, %v1098_v22  ;;  %v1102_v14 = vsel %vm506_vm1, %v1098_v22, %v1092_v47  ;;  %v1189_v27 = vmul.f32 %v1100_v41, %v2539_v17 }
 0x400   :  { %v1187_v0 = vmul.f32 %v1102_v14, %v2520_v4  ;;  %v1190_v47 = vmul.f32 %v1099_v13, %v2529_v8 }
 0x401   :  { %v1104_v35 = vpop.permute.xlu1 %1103 }
 0x402   :  { %v1106_v43 = vpop.permute.xlu0 %1105 }
 0x403   :  { %v1113_v7 = vsel %vm519_vm2, %v1104_v35, %v1106_v43 }
 0x404   :  { %v1192_v30 = vmul.f32 %v1113_v7, %v2515_v62 }
 0x405   :  { %v1108_v44 = vpop.permute.xlu1 %1107 }
 0x406   :  { %v1112_v6 = vsel %vm519_vm2, %v1106_v43, %v1108_v44  ;;  %v1110_v21 = vpop.permute.xlu0 %1109  ;;  %v1689_v63 = vpack.c.bf16 %v1192_v30, %v1188_v12 }
 0x407   :  { %v1193_v20 = vmul.f32 %v1112_v6, %v2522_v5  ;;  %v1111_v60 = vsel %vm519_vm2, %v1108_v44, %v1110_v21  ;;  %v1114_v62 = vsel %vm519_vm2, %v1110_v21, %v1104_v35 }
 0x408   :  { %v1191_v22 = vmul.f32 %v1114_v62, %v2535_v15  ;;  %v1194_v31 = vmul.f32 %v1111_v60, %v2537_v16  ;;  %1690 = vmatprep.subr.bf16.mxu0 %v1689_v63 }
 0x409   :  { %v1116_v43 = vpop.permute.xlu1 %1115  ;;  %v1707_v30 = vpack.c.bf16 %v1193_v20, %v1189_v27 }
 0x40a   :  { %v1691_v7 = vpack.c.bf16 %v1191_v22, %v1187_v0  ;;  %v1118_v5 = vpop.permute.xlu0 %1117  ;;  %v1705_v12 = vpack.c.bf16 %v1194_v31, %v1190_v47 }
 0x40b   :  { %v1125_v4 = vsel %vm532_vm3, %v1116_v43, %v1118_v5 }
 0x40c   :  { %1692 = vmatpush1.bf16.msra.mxu0 %v1691_v7  ;;  %1706 = vmatprep.subr.bf16.mxu1 %v1705_v12  ;;  %v1196_v17 = vmul.f32 %v1125_v4, %v2555_v42 }
 0x40d   :  { %1708 = vmatpush1.bf16.msra.mxu1 %v1707_v30  ;;  %v1120_v35 = vpop.permute.xlu1 %1119 }
 0x40e   :  { %v1122_v44 = vpop.permute.xlu0 %1121  ;;  %v1124_v6 = vsel %vm532_vm3, %v1118_v5, %v1120_v35 }
 0x40f   :  { %v1123_v20 = vsel %vm532_vm3, %v1120_v35, %v1122_v44  ;;  %v1126_v14 = vsel %vm532_vm3, %v1122_v44, %v1116_v43  ;;  %v1197_v27 = vmul.f32 %v1124_v6, %v2581_v2 }
 0x410   :  { %v1195_v0 = vmul.f32 %v1126_v14, %v2564_v52  ;;  %v1198_v47 = vmul.f32 %v1123_v20, %v2571_v57  ;;  %v1203_v57 = vmul.f32 %v2815_v36, %v2595_v23  ;;  %v1205_v23 = vmul.f32 %v2823_v59, %v2612_v48 }
 0x411   :  { %v1128_v8 = vpop.permute.xlu1 %1127 }
 0x412   :  { %v1130_v15 = vpop.permute.xlu0 %1129 }
 0x413   :  { %v1137_v16 = vsel %vm545_vm4, %v1128_v8, %v1130_v15 }
 0x414   :  { %v1200_v13 = vmul.f32 %v1137_v16, %v2559_v45 }
 0x415   :  { %v1132_v41 = vpop.permute.xlu1 %1131 }
 0x416   :  { %v1136_v21 = vsel %vm545_vm4, %v1130_v15, %v1132_v41  ;;  %v1134_v63 = vpop.permute.xlu0 %1133  ;;  %v1693_v60 = vpack.c.bf16 %v1200_v13, %v1196_v17  ;;  %v1206_v15 = vmul.f32 %v2825_v50, %v2620_v56 }
 0x417   :  { %v1201_v62 = vmul.f32 %v1136_v21, %v2566_v53  ;;  %v1135_v42 = vsel %vm545_vm4, %v1132_v41, %v1134_v63  ;;  %v1138_v45 = vsel %vm545_vm4, %v1134_v63, %v1128_v8  ;;  %v1204_v8 = vmul.f32 %v2817_v58, %v2602_v29 }
 0x418   :  { %v1199_v22 = vmul.f32 %v1138_v45, %v2577_v61  ;;  %v1202_v31 = vmul.f32 %v1135_v42, %v2579_v1  ;;  %1694 = vmatprep.subr.bf16.mxu0 %v1693_v60 }
 0x419   :  { %v1140_v43 = vpop.permute.xlu1 %1139  ;;  %v1711_v12 = vpack.c.bf16 %v1201_v62, %v1197_v27 }
 0x41a   :  { %v1695_v7 = vpack.c.bf16 %v1199_v22, %v1195_v0  ;;  %v1142_v53 = vpop.permute.xlu0 %1141  ;;  %v1709_v5 = vpack.c.bf16 %v1202_v31, %v1198_v47 }
 0x41b   :  { %v1149_v30 = vsel %vm558_vm5, %v1140_v43, %v1142_v53 }
 0x41c   :  { %1696 = vmatpush1.bf16.msra.mxu0 %v1695_v7  ;;  %1710 = vmatprep.subr.bf16.mxu1 %v1709_v5  ;;  %v1207_v61 = vmul.f32 %v1149_v30, %v2598_v25 }
 0x41d   :  { %1712 = vmatpush1.bf16.msra.mxu1 %v1711_v12  ;;  %v1144_v52 = vpop.permute.xlu1 %1143 }
 0x41e   :  { %v1148_v1 = vsel %vm558_vm5, %v1142_v53, %v1144_v52  ;;  %v1146_v2 = vpop.permute.xlu0 %1145  ;;  %v1699_v17 = vpack.c.bf16 %v1207_v61, %v1203_v57 }
 0x41f   :  { %v1208_v35 = vmul.f32 %v1148_v1, %v2600_v26  ;;  %v1147_v44 = vsel %vm558_vm5, %v1144_v52, %v1146_v2  ;;  %v1150_v4 = vsel %vm558_vm5, %v1146_v2, %v1140_v43  ;;  %v1223_v1 = vld [vmem:[#allocation16] sm:$0xff]  ;;  %v3041_v2 = vld [vmem:[#allocation31_spill] sm:$0xff] }
 0x420   :  { %v1209_v25 = vmul.f32 %v1147_v44, %v2616_v51  ;;  %v1210_v36 = vmul.f32 %v1150_v4, %v2618_v54 }
 0x421   :  { %v1152_v26 = vpop.permute.xlu1 %1151  ;;  %v1697_v16 = vpack.c.bf16 %v1208_v35, %v1204_v8  ;;  %v3042_v35 = vld [vmem:[#allocation33_spill] sm:$0xff] }
 0x422   :  { %v1715_v13 = vpack.c.bf16 %v1209_v25, %v1205_v23  ;;  %v1154_v20 = vpop.permute.xlu0 %1153  ;;  %v1713_v14 = vpack.c.bf16 %v1210_v36, %v1206_v15  ;;  %v3043_v36 = vld [vmem:[#allocation34_spill] sm:$0xff] }
 0x423   :  { %1698 = vmatprep.subr.bf16.mxu0 %v1697_v16  ;;  %v1161_v51 = vsel %vm571_vm6, %v1152_v26, %v1154_v20 }
 0x424   :  { %1700 = vmatpush1.bf16.msra.mxu0 %v1699_v17  ;;  %1714 = vmatprep.subr.bf16.mxu1 %v1713_v14  ;;  %v1211_v21 = vmul.f32 %v1161_v51, %v2633_v28 }
 0x425   :  { %1716 = vmatpush1.bf16.msra.mxu1 %v1715_v13  ;;  %v1156_v29 = vpop.permute.xlu1 %1155 }
 0x426   :  { %v1158_v58 = vpop.permute.xlu0 %1157  ;;  %v1160_v56 = vsel %vm571_vm6, %v1154_v20, %v1156_v29 }
 0x427   :  { %v1159_v50 = vsel %vm571_vm6, %v1156_v29, %v1158_v58  ;;  %v1162_v41 = vsel %vm571_vm6, %v1158_v58, %v1152_v26  ;;  %v1212_v42 = vmul.f32 %v1160_v56, %v2636_v24 }
 0x428   :  { %v1213_v22 = vmul.f32 %v1159_v50, %v2652_v49  ;;  %v1214_v28 = vmul.f32 %v1162_v41, %v2656_v3 }
 0x429   :  { %v1164_v48 = vpop.permute.xlu1 %1163 }
 0x42a   :  { %v1166_v59 = vpop.permute.xlu0 %1165 }
 0x42b   :  { %v1173_v54 = vsel %vm584_vm7, %v1164_v48, %v1166_v59 }
 0x42c   :  { %v1215_v63 = vmul.f32 %v1173_v54, %v2642_v32 }
 0x42d   :  { %v1168_v6 = vpop.permute.xlu1 %1167 }
 0x42e   :  { %v1172_v60 = vsel %vm584_vm7, %v1166_v59, %v1168_v6  ;;  %v1170_v62 = vpop.permute.xlu0 %1169  ;;  %v1703_v7 = vpack.c.bf16 %v1215_v63, %v1211_v21 }
 0x42f   :  { %v1216_v45 = vmul.f32 %v1172_v60, %v2644_v34  ;;  %v1171_v0 = vsel %vm584_vm7, %v1168_v6, %v1170_v62  ;;  %v1174_v47 = vsel %vm584_vm7, %v1170_v62, %v1164_v48 }
 0x430   :  { %v1217_v32 = vmul.f32 %v1171_v0, %v2662_v33  ;;  %v1218_v31 = vmul.f32 %v1174_v47, %v2664_v10 }
 0x431   :  { %v1176_v27 = vpop.permute.xlu1 %1175  ;;  %v1701_v43 = vpack.c.bf16 %v1216_v45, %v1212_v42 }
 0x432   :  { %v1719_v24 = vpack.c.bf16 %v1217_v32, %v1213_v22  ;;  %v1178_v53 = vpop.permute.xlu0 %1177  ;;  %v1717_v34 = vpack.c.bf16 %v1218_v31, %v1214_v28 }
 0x433   :  { %1702 = vmatprep.subr.bf16.mxu0 %v1701_v43  ;;  %v1185_v5 = vsel %vm597_vm8, %v1176_v27, %v1178_v53 }
 0x434   :  { %1704 = vmatpush1.bf16.msra.mxu0 %v1703_v7  ;;  %1718 = vmatprep.subr.bf16.mxu1 %v1717_v34  ;;  %v1219_v52 = vmul.f32 %v1185_v5, %v2675_v37  ;;  %v1384_v5 = vld [vmem:[#allocation19 + $0x8] sm:$0xff] }
 0x435   :  { %1720 = vmatpush1.bf16.msra.mxu1 %v1719_v24  ;;  %v1180_v49 = vpop.permute.xlu1 %1179 }
 0x436   :  { %v1184_v3 = vsel %vm597_vm8, %v1178_v53, %v1180_v49  ;;  %v1182_v33 = vpop.permute.xlu0 %1181  ;;  %v1383_v53 = vld [vmem:[#allocation19] sm:$0xff] }
 0x437   :  { %v1220_v10 = vmul.f32 %v1184_v3, %v2677_v38  ;;  %v1183_v12 = vsel %vm597_vm8, %v1180_v49, %v1182_v33  ;;  %v1186_v30 = vsel %vm597_vm8, %v1182_v33, %v1176_v27  ;;  %v3040_v38 = vld [vmem:[#allocation32_spill] sm:$0xff] }
 0x438   :  { %v1221_v57 = vmul.f32 %v1183_v12, %v2685_v9  ;;  %v1222_v61 = vmul.f32 %v1186_v30, %v2687_v18 }
 0x439   :  { %1249 = vmatprep.subr.mxu0 %v1220_v10 }
 0x43a   :  { %1250 = vmatpush1.msra.mxu0 %v1219_v52  ;;  %1320 = vmatprep.subr.mxu1 %v1222_v61 }
 0x43b   :  { %1619 = vmatmul.mubr.msk.f32.vlgmr.msra.gmra.mrb[14].mxu0 %vm645_vm9, %v1223_v1  ;;  %1321 = vmatpush1.msra.mxu1 %v1221_v57 }
 0x43c   :  { %1620 = vmatmul.mubr.msk.f32.vlgmr.msra.gmra.mrb[14].mxu1 %vm645_vm9, %v1223_v1  ;;  %1468 = vmatprep.mubr.f32.mxu0 %v3038_v46 }
 0x43d   :  { %1545 = vmatprep.mubr.f32.mxu1 %v3038_v46 }
 0x446   :  { %v244_v55 = vpop.permute.xlu1 %243 }
 0x447   :  { %v349_v37 = vadd.f32 %v2349_v11, %v244_v55  ;;  %v351_v9 = vadd.f32 %v3040_v38, %v244_v55  ;;  %v444_v18 = vadd.f32 %v3041_v2, %v244_v55  ;;  %v446_v44 = vadd.f32 %v3042_v35, %v244_v55  ;;  %v643_v4 = vpop.permute.xlu0 %642 }
 0x448   :  { %v716_v8 = vadd.f32 %v2807_v40, %v643_v4  ;;  %v718_v23 = vadd.f32 %v2809_v19, %v643_v4  ;;  %v787_v25 = vadd.f32 %v2811_v39, %v643_v4  ;;  %v789_v15 = vadd.f32 %v3043_v36, %v643_v4 }
 0x449   :  { %v472_v26 = vmax.f32 %v349_v37, 0.0  ;;  %v473_v16 = vmax.f32 %v351_v9, 0.0  ;;  %v474_v17 = vmax.f32 %v444_v18, 0.0  ;;  %v475_v13 = vmax.f32 %v446_v44, 0.0 }
 0x44a   :  { %v791_v11 = vmax.f32 %v716_v8, 0.0  ;;  %v792_v20 = vmax.f32 %v718_v23, 0.0  ;;  %v793_v14 = vmax.f32 %v787_v25, 0.0  ;;  %v794_v29 = vmax.f32 %v789_v15, 0.0  ;;  %v1228_v21 = vpop.permute.xlu1 %1227 }
 0x44b   :  { %v484_v58 = vmin.f32 %v472_v26, 6.0  ;;  %v486_v48 = vmin.f32 %v474_v17, 6.0  ;;  %v485_v59 = vmin.f32 %v473_v16, 6.0  ;;  %v487_v51 = vmin.f32 %v475_v13, 6.0  ;;  %v259_v49 = vpop.permute.xlu0 %258 }
 0x44c   :  { %v795_v54 = vmin.f32 %v791_v11, 6.0  ;;  %v797_v40 = vmin.f32 %v793_v14, 6.0  ;;  %v796_v56 = vmin.f32 %v792_v20, 6.0  ;;  %v798_v19 = vmin.f32 %v794_v29, 6.0 }
 0x44e   :  { %v1721_v50 = vpack.c.bf16 %v796_v56, %v485_v59  ;;  %v1725_v39 = vpack.c.bf16 %v798_v19, %v487_v51  ;;  %v1723_v41 = vpack.c.bf16 %v795_v54, %v484_v58  ;;  %v1727_v6 = vpack.c.bf16 %v797_v40, %v486_v48  ;;  %v264_v3 = vpop.permute.xlu1 %263 }
 0x44f   :  { %v1390_v33 = vpop.permute.xlu0 %1389 }
 0x450   :  { %1722 = vmatprep.subr.bf16.mxu0 %v1721_v50  ;;  %1726 = vmatprep.subr.bf16.mxu1 %v1725_v39  ;;  %v1729_v10 = vadd.f32 %v1390_v33, %v259_v49 }
 0x451   :  { %1724 = vmatpush1.bf16.msra.mxu0 %v1723_v41  ;;  %1728 = vmatpush1.bf16.msra.mxu1 %v1727_v6 }
 0x452   :  { %v1395_v12 = vpop.permute.xlu1 %1394 }
 0x453   :  { %v1733_v38 = vadd.f32 %v1395_v12, %v264_v3 }
 0x50e   :  { %v1299_v63 = vpop.f32.mrb[14].mxu0 }
 0x50f   :  { %v1300_v60 = vadd.f32 %v1299_v63, %v1228_v21  ;;  %v1301_v62 = vpop.f32.mrb[15].mxu0  ;;  %v1370_v42 = vpop.f32.mrb[14].mxu1 }
 0x510   :  { %v1302_v45 = vadd.f32 %v1301_v62, %v1228_v21  ;;  %v1371_v0 = vadd.f32 %v1370_v42, %v1228_v21  ;;  %v1372_v47 = vpop.f32.mrb[15].mxu1 }
 0x511   :  { %v1375_v22 = vmax.f32 %v1300_v60, 0.0  ;;  %v1373_v28 = vadd.f32 %v1372_v47, %v1228_v21 }
 0x512   :  { %v1376_v32 = vmax.f32 %v1302_v45, 0.0  ;;  %v1377_v31 = vmax.f32 %v1371_v0, 0.0 }
 0x513   :  { %v1378_v27 = vmax.f32 %v1373_v28, 0.0  ;;  %v1379_v7 = vmin.f32 %v1375_v22, 6.0 }
 0x514   :  { %v1380_v43 = vmin.f32 %v1376_v32, 6.0  ;;  %v1381_v34 = vmin.f32 %v1377_v31, 6.0 }
 0x515   :  { %v1382_v24 = vmin.f32 %v1378_v27, 6.0 }
 0x516   :  { %1408 = vmatprep.subr.mxu0 %v1380_v43 }
 0x517   :  { %1409 = vmatpush1.msra.mxu0 %v1379_v7  ;;  %1485 = vmatprep.subr.mxu1 %v1382_v24 }
 0x518   :  { %1621 = vmatmul.mubr.msk.f32.vlgmr.msra.gmra.mrb[6].mxu0 %vm1397_vm10, %v1383_v53  ;;  %1486 = vmatpush1.msra.mxu1 %v1381_v34 }
 0x519   :  { %1623 = vmatmul.mubr.msk.f32.vlgmr.msra.gmra.mrb[6].mxu1 %vm1397_vm10, %v1383_v53  ;;  %1474 = vmatprep.mubr.f32.mxu0 %v3038_v46 }
 0x51a   :  { %1551 = vmatprep.mubr.f32.mxu1 %v3038_v46 }
 0x51c   :  { %1622 = vmatmul.mubr.msk.f32.gmra.mrb[8].mxu0 %vm1397_vm10, %v1384_v5 }
 0x51d   :  { %1624 = vmatmul.mubr.msk.f32.gmra.mrb[8].mxu1 %vm1397_vm10, %v1384_v5 }
 0x5eb   :  { %v1470_v30 = vpop.f32.mrb[6].mxu0 }
 0x5ec   :  { %v1730_v52 = vadd.f32 %v1729_v10, %v1470_v30  ;;  %v1472_v57 = vpop.f32.mrb[7].mxu0  ;;  %v1547_v61 = vpop.f32.mrb[6].mxu1 }
 0x5ed   :  { %v1732_v1 = vadd.f32 %v1729_v10, %v1472_v57  ;;  %v1738_v55 = vadd.f32 %v1729_v10, %v1547_v61  ;;  %v1549_v37 = vpop.f32.mrb[7].mxu1 }
 0x5ee   :  { %v1566_v9 = vmax.f32 %v1730_v52, 0.0  ;;  %v1740_v2 = vadd.f32 %v1729_v10, %v1549_v37 }
 0x5ef   :  { %v1567_v18 = vmax.f32 %v1732_v1, 0.0  ;;  %v1568_v35 = vmax.f32 %v1738_v55, 0.0  ;;  %v1476_v46 = vpop.f32.mrb[8].mxu0 }
 0x5f0   :  { %1574 = vst [vmem:[#allocation22] sm:$0xff] %v1566_v9  ;;  %v1569_v44 = vmax.f32 %v1740_v2, 0.0  ;;  %v1734_v4 = vadd.f32 %v1733_v38, %v1476_v46  ;;  %v1478_v8 = vpop.f32.mrb[9].mxu0  ;;  %v1553_v23 = vpop.f32.mrb[8].mxu1 }
 0x5f1   :  { %1575 = vst [vmem:[#allocation22 + $0x8] sm:$0xff] %v1567_v18  ;;  %1576 = vst [vmem:[#allocation22 + $0x10] sm:$0xff] %v1568_v35  ;;  %v1736_v25 = vadd.f32 %v1733_v38, %v1478_v8  ;;  %v1742_v36 = vadd.f32 %v1733_v38, %v1553_v23  ;;  %v1555_v15 = vpop.f32.mrb[9].mxu1 }
 0x5f2   :  { %1577 = vst [vmem:[#allocation22 + $0x18] sm:$0xff] %v1569_v44  ;;  %v1570_v26 = vmax.f32 %v1734_v4, 0.0  ;;  %v1744_v16 = vadd.f32 %v1733_v38, %v1555_v15 }
 0x5f3   :  { %v1571_v17 = vmax.f32 %v1736_v25, 0.0  ;;  %v1572_v13 = vmax.f32 %v1742_v36, 0.0 }
 0x5f4   :  { %1578 = vst [vmem:[#allocation22 + $0x20] sm:$0xff] %v1570_v26  ;;  %v1573_v11 = vmax.f32 %v1744_v16, 0.0 }
 0x5f5   :  { %1579 = vst [vmem:[#allocation22 + $0x28] sm:$0xff] %v1571_v17  ;;  %1580 = vst [vmem:[#allocation22 + $0x30] sm:$0xff] %v1572_v13 }
 0x5f6   :  { %1581 = vst [vmem:[#allocation22 + $0x38] sm:$0xff] %v1573_v11 }
 0x5f7   :  { %2057 = shalt.err (!%p2054_p2)
}
 0x5f8   :  { %s2058_s4 = scalar_lea.hbm %s3032_s12, 1024 }
 0x5f9   :  { %p2059_p3 = scmp.ne.s32.totalorder %s3032_s12, %s2058_s4  ;;  %p2062_p4 = scmp.lt.u32.totalorder %s2058_s4, %s3032_s12 }
 0x5fb   :  { %p2064_p5 = pnand %p2062_p4, %p2059_p3 }
 0x5fd   :  { %2067 = shalt.err (!%p2064_p5)
}
 0x5fe   :  { %1593 = dma.vmem_to_hbm [thread:$0]  %s1588_s5, 1024, %s3032_s12, [#allocation4], %s2085_s13, %s2085_s13, %s2086_s14  }
 0x5ff   :  { %2082 = dma.done.wait [#allocation4], 1024  }
 0x600   :  { %2083 = vsyncadd [#allocation4], 4294966272 }
 0x601   :  { %1597 = vsyncpa [#allocation3], 1 }
 0x602   :  { %1598 = vsyncpa [#allocation6], 1 }
 0x603   :  { %1599 = vsyncpa [#allocation9], 1 }
 0x604   :  { %1600 = vsyncpa [#allocation12], 1 }
 0x605   :  { %1601 = vsyncpa [#allocation15], 1 }
 0x606   :  { %1602 = vsyncpa [#allocation18], 1 }
 0x607   :  { %1603 = vsyncpa [#allocation21], 1 }
 0x608   :  { %1604 = vsyncpa [#allocation4], 1 }

</bundles_post_ra>
